<compile_context>
chip_gen: v7x
topology: tpu7x:2x2x1
jax: 0.10.0
libtpu: 0.0.40
codegen_flags: <defaults>
</compile_context>

<pallas_src>
import functools

import jax
import jax.numpy as jnp
from jax.experimental import pallas as pl
from jax.experimental.pallas import tpu as pltpu

EPS = 1e-5
LANE = 128


def _round_up(x, m):
    return (x + m - 1) // m * m


# --------------------------------------------------------------------------
# Fused BasicBlock kernel (one batch image per grid step)
# --------------------------------------------------------------------------
def _basic_block_kernel(*refs, H, W, Ho, Wo, stride, has_proj):
    if has_proj:
        (x_ref, w1_ref, s1_ref, b1_ref, w2_ref, s2_ref, b2_ref,
         ws_ref, ss_ref, bs_ref, o_ref, xpad_ref, mid_ref) = refs
    else:
        (x_ref, w1_ref, s1_ref, b1_ref, w2_ref, s2_ref, b2_ref,
         o_ref, xpad_ref, mid_ref) = refs
        ws_ref = ss_ref = bs_ref = None

    cin = xpad_ref.shape[-1]
    cout = o_ref.shape[-1]

    def tap(ref, dy, dx, s, h, w):
        # Strided window load straight from the VMEM halo scratch.
        if s == 1:
            return ref[pl.ds(dy, h), pl.ds(dx, w), :]
        return ref[pl.ds(dy, h, s), pl.ds(dx, w, s), :]

    def conv3x3(src_ref, w_ref, s, h, w, c_in, c_out):
        # 9-tap unroll; each tap is one MXU channel-matmul, f32 accumulation.
        acc = jnp.zeros((h * w, c_out), jnp.float32)
        for dy in range(3):
            for dx in range(3):
                t = tap(src_ref, dy, dx, s, h, w).reshape(h * w, c_in)
                acc = acc + jnp.dot(t, w_ref[dy, dx],
                                    preferred_element_type=jnp.float32)
        return acc

    # ---- halo padding fused in-kernel (VMEM scratch, no HBM padded copy) ----
    xpad_ref[...] = jnp.zeros_like(xpad_ref)
    xpad_ref[pl.ds(1, H), pl.ds(1, W), :] = x_ref[0]

    # ---- conv1 (3x3, stride) + bn1 + relu -----------------------------------
    a1 = conv3x3(xpad_ref, w1_ref, stride, Ho, Wo, cin, cout)
    h1 = jnp.maximum(a1 * s1_ref[...] + b1_ref[...], 0.0)

    mid_ref[...] = jnp.zeros_like(mid_ref)
    mid_ref[pl.ds(1, Ho), pl.ds(1, Wo), :] = (
        h1.reshape(Ho, Wo, cout).astype(mid_ref.dtype))

    # ---- conv2 (3x3, stride 1) + bn2 ----------------------------------------
    a2 = conv3x3(mid_ref, w2_ref, 1, Ho, Wo, cout, cout)
    y = a2 * s2_ref[...] + b2_ref[...]

    # ---- shortcut -----------------------------------------------------------
    if has_proj:
        xs = tap(xpad_ref, 1, 1, stride, Ho, Wo).reshape(Ho * Wo, cin)
        sc = jnp.dot(xs, ws_ref[...], preferred_element_type=jnp.float32)
        sc = sc * ss_ref[...] + bs_ref[...]
    else:
        sc = tap(xpad_ref, 1, 1, 1, Ho, Wo).reshape(Ho * Wo, cout)
        sc = sc.astype(jnp.float32)

    out = jnp.maximum(y + sc, 0.0)
    o_ref[0] = out.reshape(Ho, Wo, cout).astype(o_ref.dtype)


# --------------------------------------------------------------------------
# Wrapper: NCHW public interface, NHWC + lane-padded channels inside
# --------------------------------------------------------------------------
def basic_block_forward(x_nchw, p, stride, *, compute_dtype=jnp.float32):
    x = jnp.transpose(x_nchw, (0, 2, 3, 1)).astype(compute_dtype)  # NCHW->NHWC
    N, H, W, cin = x.shape
    planes = p["W1"].shape[0]
    Ho = (H - 1) // stride + 1
    Wo = (W - 1) // stride + 1
    has_proj = (stride != 1) or (cin != planes)

    cin_p = _round_up(cin, LANE)     # lane-dense channel padding; no-op when
    cout_p = _round_up(planes, LANE)  # channels are already multiples of 128

    def pad_last(a, target):
        d = target - a.shape[-1]
        if d == 0:
            return a
        return jnp.pad(a, [(0, 0)] * (a.ndim - 1) + [(0, d)])

    def prep_w3x3(w, ci_t, co_t):
        w = jnp.transpose(w, (2, 3, 1, 0)).astype(compute_dtype)  # OIHW->HWIO
        return jnp.pad(w, ((0, 0), (0, 0),
                           (0, ci_t - w.shape[2]), (0, co_t - w.shape[3])))

    def fold_bn(bn, c_t):
        s = bn["gamma"] / jnp.sqrt(bn["var"] + EPS)
        b = bn["beta"] - bn["mean"] * s
        return (pad_last(s.reshape(1, -1).astype(jnp.float32), c_t),
                pad_last(b.reshape(1, -1).astype(jnp.float32), c_t))

    x_p = pad_last(x, cin_p)
    w1 = prep_w3x3(p["W1"], cin_p, cout_p)
    w2 = prep_w3x3(p["W2"], cout_p, cout_p)
    s1, b1 = fold_bn(p["bn1"], cout_p)
    s2, b2 = fold_bn(p["bn2"], cout_p)

    def rep(*shape):  # block resident across the (batch-parallel) grid
        return pl.BlockSpec(shape, lambda n: (0,) * len(shape))

    inputs = [x_p, w1, s1, b1, w2, s2, b2]
    in_specs = [
        pl.BlockSpec((1, H, W, cin_p), lambda n: (n, 0, 0, 0)),
        rep(3, 3, cin_p, cout_p),
        rep(1, cout_p), rep(1, cout_p),
        rep(3, 3, cout_p, cout_p),
        rep(1, cout_p), rep(1, cout_p),
    ]
    if has_proj:
        ws = jnp.pad(p["Ws"][:, :, 0, 0].T.astype(compute_dtype),
                     ((0, cin_p - cin), (0, cout_p - planes)))
        ss, bs = fold_bn(p["bns"], cout_p)
        inputs += [ws, ss, bs]
        in_specs += [rep(cin_p, cout_p), rep(1, cout_p), rep(1, cout_p)]

    kernel = functools.partial(_basic_block_kernel, H=H, W=W, Ho=Ho, Wo=Wo,
                               stride=stride, has_proj=has_proj)

    out = pl.pallas_call(
        kernel,
        out_shape=jax.ShapeDtypeStruct((N, Ho, Wo, cout_p), jnp.float32),
        grid=(N,),
        in_specs=in_specs,
        out_specs=pl.BlockSpec((1, Ho, Wo, cout_p), lambda n: (n, 0, 0, 0)),
        scratch_shapes=[
            pltpu.VMEM((H + 2, W + 2, cin_p), compute_dtype),    # halo of x
            pltpu.VMEM((Ho + 2, Wo + 2, cout_p), compute_dtype), # halo of out1
        ],
        compiler_params=pltpu.CompilerParams(
            dimension_semantics=("parallel",),      # batch split across TCs
            vmem_limit_bytes=32 * 1024 * 1024,      # explicit, safe on v5e/v6e/v7x
        ),
    )(*inputs)

    out = out[..., :planes]                          # drop lane padding
    return jnp.transpose(out, (0, 3, 1, 2))          # NHWC -> NCHW


# --------------------------------------------------------------------------
# Parameter init (deterministic, synthetic)
# --------------------------------------------------------------------------
def init_params(key, in_planes, planes):
    ks = jax.random.split(key, 6)

    def conv_w(k, shape):
        return 0.1 * jax.random.normal(k, shape, jnp.float32)

    def bn_p(k, c):
        k1, k2, k3, k4 = jax.random.split(k, 4)
        return dict(
            gamma=jax.random.uniform(k1, (c,), jnp.float32, 0.5, 1.5),
            beta=0.1 * jax.random.normal(k2, (c,), jnp.float32),
            mean=0.1 * jax.random.normal(k3, (c,), jnp.float32),
            var=jax.random.uniform(k4, (c,), jnp.float32, 0.5, 1.5),
        )

    return dict(
        W1=conv_w(ks[0], (planes, in_planes, 3, 3)), bn1=bn_p(ks[1], planes),
        W2=conv_w(ks[2], (planes, planes, 3, 3)),    bn2=bn_p(ks[3], planes),
        Ws=conv_w(ks[4], (planes, in_planes, 1, 1)), bns=bn_p(ks[5], planes),
    )


# --------------------------------------------------------------------------
# Pure-JAX reference (NCHW, matches PyTorch eval-mode semantics)
# --------------------------------------------------------------------------
def reference_forward(x, p, stride):
    def conv(x, w, s, pad):
        return jax.lax.conv_general_dilated(
            x, w, (s, s), [(pad, pad), (pad, pad)],
            dimension_numbers=("NCHW", "OIHW", "NCHW"),
            precision=jax.lax.Precision.HIGHEST)

    def bn(x, d):
        sc = d["gamma"] / jnp.sqrt(d["var"] + EPS)
        sh = d["beta"] - d["mean"] * sc
        return x * sc[None, :, None, None] + sh[None, :, None, None]

    out = jax.nn.relu(bn(conv(x, p["W1"], stride, 1), p["bn1"]))
    out = bn(conv(out, p["W2"], 1, 1), p["bn2"])
    cin, planes = x.shape[1], p["W1"].shape[0]
    if stride != 1 or cin != planes:
        short = bn(conv(x, p["Ws"], stride, 0), p["bns"])
    else:
        short = x
    return jax.nn.relu(out + short)


if __name__ == "__main__":
    key = jax.random.PRNGKey(0)
    cases = [
        dict(in_planes=8, planes=4, stride=2, N=2, H=16, W=16),  # projection shortcut
        dict(in_planes=4, planes=4, stride=1, N=2, H=16, W=16),  # identity shortcut
    ]
    for i, c in enumerate(cases):
        kx, kp = jax.random.split(jax.random.fold_in(key, i))
        x = jax.random.normal(kx, (c["N"], c["in_planes"], c["H"], c["W"]),
                              jnp.float32)
        params = init_params(kp, c["in_planes"], c["planes"])

        out = jax.block_until_ready(basic_block_forward(x, params, c["stride"]))
        ref = reference_forward(x, params, c["stride"])

        assert out.shape == ref.shape, (out.shape, ref.shape)
        if not bool(jnp.allclose(out, ref, atol=2e-3, rtol=2e-3)):
            max_err = float(jnp.max(jnp.abs(out - ref)))
            raise AssertionError(
                f"case {i}: Pallas output mismatch vs reference, max abs err {max_err}")
    print("KERNEL_OK")
</pallas_src>

<mosaic_0001>
module attributes {stable_mosaic.version = 11 : i64} {
  func.func @_basic_block_kernel(%arg0: i32, %arg1: memref<1x16x16x128xf32, #tpu.memory_space<vmem>>, %arg2: memref<3x3x128x128xf32, #tpu.memory_space<vmem>>, %arg3: memref<1x128xf32, #tpu.memory_space<vmem>>, %arg4: memref<1x128xf32, #tpu.memory_space<vmem>>, %arg5: memref<3x3x128x128xf32, #tpu.memory_space<vmem>>, %arg6: memref<1x128xf32, #tpu.memory_space<vmem>>, %arg7: memref<1x128xf32, #tpu.memory_space<vmem>>, %arg8: memref<128x128xf32, #tpu.memory_space<vmem>>, %arg9: memref<1x128xf32, #tpu.memory_space<vmem>>, %arg10: memref<1x128xf32, #tpu.memory_space<vmem>>, %arg11: memref<1x8x8x128xf32, #tpu.memory_space<vmem>>, %arg12: memref<18x18x128xf32, #tpu.memory_space<vmem>>, %arg13: memref<10x10x128xf32, #tpu.memory_space<vmem>>) attributes {dimension_semantics = [#tpu.dimension_semantics<parallel>], iteration_bounds = array<i64: 2>, scalar_prefetch = 0 : i64, scratch_operands = 2 : i64, tpu.core_type = #tpu.core_type<tc>, window_params = [{transform_indices = @transform_0, window_bounds = array<i64: 1, 16, 16, 128>}, {pipeline_mode = #tpu.pipeline_mode<synchronous>, transform_indices = @transform_1, window_bounds = array<i64: 3, 3, 128, 128>}, {pipeline_mode = #tpu.pipeline_mode<synchronous>, transform_indices = @transform_2, window_bounds = array<i64: 1, 128>}, {pipeline_mode = #tpu.pipeline_mode<synchronous>, transform_indices = @transform_3, window_bounds = array<i64: 1, 128>}, {pipeline_mode = #tpu.pipeline_mode<synchronous>, transform_indices = @transform_4, window_bounds = array<i64: 3, 3, 128, 128>}, {pipeline_mode = #tpu.pipeline_mode<synchronous>, transform_indices = @transform_5, window_bounds = array<i64: 1, 128>}, {pipeline_mode = #tpu.pipeline_mode<synchronous>, transform_indices = @transform_6, window_bounds = array<i64: 1, 128>}, {pipeline_mode = #tpu.pipeline_mode<synchronous>, transform_indices = @transform_7, window_bounds = array<i64: 128, 128>}, {pipeline_mode = #tpu.pipeline_mode<synchronous>, transform_indices = @transform_8, window_bounds = array<i64: 1, 128>}, {pipeline_mode = #tpu.pipeline_mode<synchronous>, transform_indices = @transform_9, window_bounds = array<i64: 1, 128>}, {transform_indices = @transform_10, window_bounds = array<i64: 1, 8, 8, 128>}]} {
    %cst = arith.constant 0.000000e+00 : f32
    %0 = vector.broadcast %cst : f32 to vector<18x18x128xf32>
    %c0 = arith.constant 0 : index
    %c0_0 = arith.constant 0 : index
    %c0_1 = arith.constant 0 : index
    %1 = vector.load %arg12[%c0, %c0_0, %c0_1] : memref<18x18x128xf32, #tpu.memory_space<vmem>>, vector<18x18x128xf32>
    tpu.vector_store %arg12[%c0, %c0_0, %c0_1], %0 {strides = array<i32>} : memref<18x18x128xf32, #tpu.memory_space<vmem>>, vector<18x18x128xf32>,
    %c0_2 = arith.constant 0 : index
    %c0_3 = arith.constant 0 : index
    %c0_4 = arith.constant 0 : index
    %c0_5 = arith.constant 0 : index
    %2 = vector.load %arg1[%c0_2, %c0_3, %c0_4, %c0_5] : memref<1x16x16x128xf32, #tpu.memory_space<vmem>>, vector<1x16x16x128xf32>
    %3 = vector.shape_cast %2 : vector<1x16x16x128xf32> to vector<16x16x128xf32>
    %c1 = arith.constant 1 : index
    %c1_6 = arith.constant 1 : index
    %c0_7 = arith.constant 0 : index
    %4 = vector.load %arg12[%c1, %c1_6, %c0_7] : memref<18x18x128xf32, #tpu.memory_space<vmem>>, vector<16x16x128xf32>
    tpu.vector_store %arg12[%c1, %c1_6, %c0_7], %3 {strides = array<i32>} : memref<18x18x128xf32, #tpu.memory_space<vmem>>, vector<16x16x128xf32>,
    %cst_8 = arith.constant 0.000000e+00 : f32
    %5 = vector.broadcast %cst_8 : f32 to vector<64x128xf32>
    %c0_9 = arith.constant 0 : index
    %c0_10 = arith.constant 0 : index
    %c0_11 = arith.constant 0 : index
    %6 = tpu.strided_load %arg12[%c0_9, %c0_10, %c0_11] {strides = array<i32: 2, 2, 1>} : memref<18x18x128xf32, #tpu.memory_space<vmem>>, vector<8x8x128xf32>
    %7 = vector.shape_cast %6 : vector<8x8x128xf32> to vector<64x128xf32>
    %c0_12 = arith.constant 0 : index
    %c0_13 = arith.constant 0 : index
    %c0_14 = arith.constant 0 : index
    %c0_15 = arith.constant 0 : index
    %8 = vector.load %arg2[%c0_12, %c0_13, %c0_14, %c0_15] : memref<3x3x128x128xf32, #tpu.memory_space<vmem>>, vector<1x1x128x128xf32>
    %9 = vector.shape_cast %8 : vector<1x1x128x128xf32> to vector<128x128xf32>
    %cst_16 = arith.constant dense<0.000000e+00> : vector<64x128xf32>
    %10 = tpu.matmul %7, %9, %cst_16 {dimension_numbers = #tpu.dot_dimension_numbers<[1], [0], [0], [1], [0, 0, 1, 1], [], []>} : vector<64x128xf32>, vector<128x128xf32>, vector<64x128xf32> -> vector<64x128xf32>
    %11 = arith.addf %5, %10 : vector<64x128xf32>
    %c0_17 = arith.constant 0 : index
    %c1_18 = arith.constant 1 : index
    %c0_19 = arith.constant 0 : index
    %12 = tpu.strided_load %arg12[%c0_17, %c1_18, %c0_19] {strides = array<i32: 2, 2, 1>} : memref<18x18x128xf32, #tpu.memory_space<vmem>>, vector<8x8x128xf32>
    %13 = vector.shape_cast %12 : vector<8x8x128xf32> to vector<64x128xf32>
    %c0_20 = arith.constant 0 : index
    %c1_21 = arith.constant 1 : index
    %c0_22 = arith.constant 0 : index
    %c0_23 = arith.constant 0 : index
    %14 = vector.load %arg2[%c0_20, %c1_21, %c0_22, %c0_23] : memref<3x3x128x128xf32, #tpu.memory_space<vmem>>, vector<1x1x128x128xf32>
    %15 = vector.shape_cast %14 : vector<1x1x128x128xf32> to vector<128x128xf32>
    %cst_24 = arith.constant dense<0.000000e+00> : vector<64x128xf32>
    %16 = tpu.matmul %13, %15, %cst_24 {dimension_numbers = #tpu.dot_dimension_numbers<[1], [0], [0], [1], [0, 0, 1, 1], [], []>} : vector<64x128xf32>, vector<128x128xf32>, vector<64x128xf32> -> vector<64x128xf32>
    %17 = arith.addf %11, %16 : vector<64x128xf32>
    %c0_25 = arith.constant 0 : index
    %c2 = arith.constant 2 : index
    %c0_26 = arith.constant 0 : index
    %18 = tpu.strided_load %arg12[%c0_25, %c2, %c0_26] {strides = array<i32: 2, 2, 1>} : memref<18x18x128xf32, #tpu.memory_space<vmem>>, vector<8x8x128xf32>
    %19 = vector.shape_cast %18 : vector<8x8x128xf32> to vector<64x128xf32>
    %c0_27 = arith.constant 0 : index
    %c2_28 = arith.constant 2 : index
    %c0_29 = arith.constant 0 : index
    %c0_30 = arith.constant 0 : index
    %20 = vector.load %arg2[%c0_27, %c2_28, %c0_29, %c0_30] : memref<3x3x128x128xf32, #tpu.memory_space<vmem>>, vector<1x1x128x128xf32>
    %21 = vector.shape_cast %20 : vector<1x1x128x128xf32> to vector<128x128xf32>
    %cst_31 = arith.constant dense<0.000000e+00> : vector<64x128xf32>
    %22 = tpu.matmul %19, %21, %cst_31 {dimension_numbers = #tpu.dot_dimension_numbers<[1], [0], [0], [1], [0, 0, 1, 1], [], []>} : vector<64x128xf32>, vector<128x128xf32>, vector<64x128xf32> -> vector<64x128xf32>
    %23 = arith.addf %17, %22 : vector<64x128xf32>
    %c1_32 = arith.constant 1 : index
    %c0_33 = arith.constant 0 : index
    %c0_34 = arith.constant 0 : index
    %24 = tpu.strided_load %arg12[%c1_32, %c0_33, %c0_34] {strides = array<i32: 2, 2, 1>} : memref<18x18x128xf32, #tpu.memory_space<vmem>>, vector<8x8x128xf32>
    %25 = vector.shape_cast %24 : vector<8x8x128xf32> to vector<64x128xf32>
    %c1_35 = arith.constant 1 : index
    %c0_36 = arith.constant 0 : index
    %c0_37 = arith.constant 0 : index
    %c0_38 = arith.constant 0 : index
    %26 = vector.load %arg2[%c1_35, %c0_36, %c0_37, %c0_38] : memref<3x3x128x128xf32, #tpu.memory_space<vmem>>, vector<1x1x128x128xf32>
    %27 = vector.shape_cast %26 : vector<1x1x128x128xf32> to vector<128x128xf32>
    %cst_39 = arith.constant dense<0.000000e+00> : vector<64x128xf32>
    %28 = tpu.matmul %25, %27, %cst_39 {dimension_numbers = #tpu.dot_dimension_numbers<[1], [0], [0], [1], [0, 0, 1, 1], [], []>} : vector<64x128xf32>, vector<128x128xf32>, vector<64x128xf32> -> vector<64x128xf32>
    %29 = arith.addf %23, %28 : vector<64x128xf32>
    %c1_40 = arith.constant 1 : index
    %c1_41 = arith.constant 1 : index
    %c0_42 = arith.constant 0 : index
    %30 = tpu.strided_load %arg12[%c1_40, %c1_41, %c0_42] {strides = array<i32: 2, 2, 1>} : memref<18x18x128xf32, #tpu.memory_space<vmem>>, vector<8x8x128xf32>
    %31 = vector.shape_cast %30 : vector<8x8x128xf32> to vector<64x128xf32>
    %c1_43 = arith.constant 1 : index
    %c1_44 = arith.constant 1 : index
    %c0_45 = arith.constant 0 : index
    %c0_46 = arith.constant 0 : index
    %32 = vector.load %arg2[%c1_43, %c1_44, %c0_45, %c0_46] : memref<3x3x128x128xf32, #tpu.memory_space<vmem>>, vector<1x1x128x128xf32>
    %33 = vector.shape_cast %32 : vector<1x1x128x128xf32> to vector<128x128xf32>
    %cst_47 = arith.constant dense<0.000000e+00> : vector<64x128xf32>
    %34 = tpu.matmul %31, %33, %cst_47 {dimension_numbers = #tpu.dot_dimension_numbers<[1], [0], [0], [1], [0, 0, 1, 1], [], []>} : vector<64x128xf32>, vector<128x128xf32>, vector<64x128xf32> -> vector<64x128xf32>
    %35 = arith.addf %29, %34 : vector<64x128xf32>
    %c1_48 = arith.constant 1 : index
    %c2_49 = arith.constant 2 : index
    %c0_50 = arith.constant 0 : index
    %36 = tpu.strided_load %arg12[%c1_48, %c2_49, %c0_50] {strides = array<i32: 2, 2, 1>} : memref<18x18x128xf32, #tpu.memory_space<vmem>>, vector<8x8x128xf32>
    %37 = vector.shape_cast %36 : vector<8x8x128xf32> to vector<64x128xf32>
    %c1_51 = arith.constant 1 : index
    %c2_52 = arith.constant 2 : index
    %c0_53 = arith.constant 0 : index
    %c0_54 = arith.constant 0 : index
    %38 = vector.load %arg2[%c1_51, %c2_52, %c0_53, %c0_54] : memref<3x3x128x128xf32, #tpu.memory_space<vmem>>, vector<1x1x128x128xf32>
    %39 = vector.shape_cast %38 : vector<1x1x128x128xf32> to vector<128x128xf32>
    %cst_55 = arith.constant dense<0.000000e+00> : vector<64x128xf32>
    %40 = tpu.matmul %37, %39, %cst_55 {dimension_numbers = #tpu.dot_dimension_numbers<[1], [0], [0], [1], [0, 0, 1, 1], [], []>} : vector<64x128xf32>, vector<128x128xf32>, vector<64x128xf32> -> vector<64x128xf32>
    %41 = arith.addf %35, %40 : vector<64x128xf32>
    %c2_56 = arith.constant 2 : index
    %c0_57 = arith.constant 0 : index
    %c0_58 = arith.constant 0 : index
    %42 = tpu.strided_load %arg12[%c2_56, %c0_57, %c0_58] {strides = array<i32: 2, 2, 1>} : memref<18x18x128xf32, #tpu.memory_space<vmem>>, vector<8x8x128xf32>
    %43 = vector.shape_cast %42 : vector<8x8x128xf32> to vector<64x128xf32>
    %c2_59 = arith.constant 2 : index
    %c0_60 = arith.constant 0 : index
    %c0_61 = arith.constant 0 : index
    %c0_62 = arith.constant 0 : index
    %44 = vector.load %arg2[%c2_59, %c0_60, %c0_61, %c0_62] : memref<3x3x128x128xf32, #tpu.memory_space<vmem>>, vector<1x1x128x128xf32>
    %45 = vector.shape_cast %44 : vector<1x1x128x128xf32> to vector<128x128xf32>
    %cst_63 = arith.constant dense<0.000000e+00> : vector<64x128xf32>
    %46 = tpu.matmul %43, %45, %cst_63 {dimension_numbers = #tpu.dot_dimension_numbers<[1], [0], [0], [1], [0, 0, 1, 1], [], []>} : vector<64x128xf32>, vector<128x128xf32>, vector<64x128xf32> -> vector<64x128xf32>
    %47 = arith.addf %41, %46 : vector<64x128xf32>
    %c2_64 = arith.constant 2 : index
    %c1_65 = arith.constant 1 : index
    %c0_66 = arith.constant 0 : index
    %48 = tpu.strided_load %arg12[%c2_64, %c1_65, %c0_66] {strides = array<i32: 2, 2, 1>} : memref<18x18x128xf32, #tpu.memory_space<vmem>>, vector<8x8x128xf32>
    %49 = vector.shape_cast %48 : vector<8x8x128xf32> to vector<64x128xf32>
    %c2_67 = arith.constant 2 : index
    %c1_68 = arith.constant 1 : index
    %c0_69 = arith.constant 0 : index
    %c0_70 = arith.constant 0 : index
    %50 = vector.load %arg2[%c2_67, %c1_68, %c0_69, %c0_70] : memref<3x3x128x128xf32, #tpu.memory_space<vmem>>, vector<1x1x128x128xf32>
    %51 = vector.shape_cast %50 : vector<1x1x128x128xf32> to vector<128x128xf32>
    %cst_71 = arith.constant dense<0.000000e+00> : vector<64x128xf32>
    %52 = tpu.matmul %49, %51, %cst_71 {dimension_numbers = #tpu.dot_dimension_numbers<[1], [0], [0], [1], [0, 0, 1, 1], [], []>} : vector<64x128xf32>, vector<128x128xf32>, vector<64x128xf32> -> vector<64x128xf32>
    %53 = arith.addf %47, %52 : vector<64x128xf32>
    %c2_72 = arith.constant 2 : index
    %c2_73 = arith.constant 2 : index
    %c0_74 = arith.constant 0 : index
    %54 = tpu.strided_load %arg12[%c2_72, %c2_73, %c0_74] {strides = array<i32: 2, 2, 1>} : memref<18x18x128xf32, #tpu.memory_space<vmem>>, vector<8x8x128xf32>
    %55 = vector.shape_cast %54 : vector<8x8x128xf32> to vector<64x128xf32>
    %c2_75 = arith.constant 2 : index
    %c2_76 = arith.constant 2 : index
    %c0_77 = arith.constant 0 : index
    %c0_78 = arith.constant 0 : index
    %56 = vector.load %arg2[%c2_75, %c2_76, %c0_77, %c0_78] : memref<3x3x128x128xf32, #tpu.memory_space<vmem>>, vector<1x1x128x128xf32>
    %57 = vector.shape_cast %56 : vector<1x1x128x128xf32> to vector<128x128xf32>
    %cst_79 = arith.constant dense<0.000000e+00> : vector<64x128xf32>
    %58 = tpu.matmul %55, %57, %cst_79 {dimension_numbers = #tpu.dot_dimension_numbers<[1], [0], [0], [1], [0, 0, 1, 1], [], []>} : vector<64x128xf32>, vector<128x128xf32>, vector<64x128xf32> -> vector<64x128xf32>
    %59 = arith.addf %53, %58 : vector<64x128xf32>
    %c0_80 = arith.constant 0 : index
    %c0_81 = arith.constant 0 : index
    %60 = vector.load %arg3[%c0_80, %c0_81] : memref<1x128xf32, #tpu.memory_space<vmem>>, vector<1x128xf32>
    %61 = vector.broadcast %60 : vector<1x128xf32> to vector<64x128xf32>
    %62 = arith.mulf %59, %61 : vector<64x128xf32>
    %c0_82 = arith.constant 0 : index
    %c0_83 = arith.constant 0 : index
    %63 = vector.load %arg4[%c0_82, %c0_83] : memref<1x128xf32, #tpu.memory_space<vmem>>, vector<1x128xf32>
    %64 = vector.broadcast %63 : vector<1x128xf32> to vector<64x128xf32>
    %65 = arith.addf %62, %64 : vector<64x128xf32>
    %cst_84 = arith.constant 0.000000e+00 : f32
    %66 = vector.broadcast %cst_84 : f32 to vector<64x128xf32>
    %67 = arith.maximumf %65, %66 : vector<64x128xf32>
    %cst_85 = arith.constant 0.000000e+00 : f32
    %68 = vector.broadcast %cst_85 : f32 to vector<10x10x128xf32>
    %c0_86 = arith.constant 0 : index
    %c0_87 = arith.constant 0 : index
    %c0_88 = arith.constant 0 : index
    %69 = vector.load %arg13[%c0_86, %c0_87, %c0_88] : memref<10x10x128xf32, #tpu.memory_space<vmem>>, vector<10x10x128xf32>
    tpu.vector_store %arg13[%c0_86, %c0_87, %c0_88], %68 {strides = array<i32>} : memref<10x10x128xf32, #tpu.memory_space<vmem>>, vector<10x10x128xf32>,
    %70 = vector.shape_cast %67 : vector<64x128xf32> to vector<8x8x128xf32>
    %c1_89 = arith.constant 1 : index
    %c1_90 = arith.constant 1 : index
    %c0_91 = arith.constant 0 : index
    %71 = vector.load %arg13[%c1_89, %c1_90, %c0_91] : memref<10x10x128xf32, #tpu.memory_space<vmem>>, vector<8x8x128xf32>
    tpu.vector_store %arg13[%c1_89, %c1_90, %c0_91], %70 {strides = array<i32>} : memref<10x10x128xf32, #tpu.memory_space<vmem>>, vector<8x8x128xf32>,
    %cst_92 = arith.constant 0.000000e+00 : f32
    %72 = vector.broadcast %cst_92 : f32 to vector<64x128xf32>
    %c0_93 = arith.constant 0 : index
    %c0_94 = arith.constant 0 : index
    %c0_95 = arith.constant 0 : index
    %73 = vector.load %arg13[%c0_93, %c0_94, %c0_95] : memref<10x10x128xf32, #tpu.memory_space<vmem>>, vector<8x8x128xf32>
    %74 = vector.shape_cast %73 : vector<8x8x128xf32> to vector<64x128xf32>
    %c0_96 = arith.constant 0 : index
    %c0_97 = arith.constant 0 : index
    %c0_98 = arith.constant 0 : index
    %c0_99 = arith.constant 0 : index
    %75 = vector.load %arg5[%c0_96, %c0_97, %c0_98, %c0_99] : memref<3x3x128x128xf32, #tpu.memory_space<vmem>>, vector<1x1x128x128xf32>
    %76 = vector.shape_cast %75 : vector<1x1x128x128xf32> to vector<128x128xf32>
    %cst_100 = arith.constant dense<0.000000e+00> : vector<64x128xf32>
    %77 = tpu.matmul %74, %76, %cst_100 {dimension_numbers = #tpu.dot_dimension_numbers<[1], [0], [0], [1], [0, 0, 1, 1], [], []>} : vector<64x128xf32>, vector<128x128xf32>, vector<64x128xf32> -> vector<64x128xf32>
    %78 = arith.addf %72, %77 : vector<64x128xf32>
    %c0_101 = arith.constant 0 : index
    %c1_102 = arith.constant 1 : index
    %c0_103 = arith.constant 0 : index
    %79 = vector.load %arg13[%c0_101, %c1_102, %c0_103] : memref<10x10x128xf32, #tpu.memory_space<vmem>>, vector<8x8x128xf32>
    %80 = vector.shape_cast %79 : vector<8x8x128xf32> to vector<64x128xf32>
    %c0_104 = arith.constant 0 : index
    %c1_105 = arith.constant 1 : index
    %c0_106 = arith.constant 0 : index
    %c0_107 = arith.constant 0 : index
    %81 = vector.load %arg5[%c0_104, %c1_105, %c0_106, %c0_107] : memref<3x3x128x128xf32, #tpu.memory_space<vmem>>, vector<1x1x128x128xf32>
    %82 = vector.shape_cast %81 : vector<1x1x128x128xf32> to vector<128x128xf32>
    %cst_108 = arith.constant dense<0.000000e+00> : vector<64x128xf32>
    %83 = tpu.matmul %80, %82, %cst_108 {dimension_numbers = #tpu.dot_dimension_numbers<[1], [0], [0], [1], [0, 0, 1, 1], [], []>} : vector<64x128xf32>, vector<128x128xf32>, vector<64x128xf32> -> vector<64x128xf32>
    %84 = arith.addf %78, %83 : vector<64x128xf32>
    %c0_109 = arith.constant 0 : index
    %c2_110 = arith.constant 2 : index
    %c0_111 = arith.constant 0 : index
    %85 = vector.load %arg13[%c0_109, %c2_110, %c0_111] : memref<10x10x128xf32, #tpu.memory_space<vmem>>, vector<8x8x128xf32>
    %86 = vector.shape_cast %85 : vector<8x8x128xf32> to vector<64x128xf32>
    %c0_112 = arith.constant 0 : index
    %c2_113 = arith.constant 2 : index
    %c0_114 = arith.constant 0 : index
    %c0_115 = arith.constant 0 : index
    %87 = vector.load %arg5[%c0_112, %c2_113, %c0_114, %c0_115] : memref<3x3x128x128xf32, #tpu.memory_space<vmem>>, vector<1x1x128x128xf32>
    %88 = vector.shape_cast %87 : vector<1x1x128x128xf32> to vector<128x128xf32>
    %cst_116 = arith.constant dense<0.000000e+00> : vector<64x128xf32>
    %89 = tpu.matmul %86, %88, %cst_116 {dimension_numbers = #tpu.dot_dimension_numbers<[1], [0], [0], [1], [0, 0, 1, 1], [], []>} : vector<64x128xf32>, vector<128x128xf32>, vector<64x128xf32> -> vector<64x128xf32>
    %90 = arith.addf %84, %89 : vector<64x128xf32>
    %c1_117 = arith.constant 1 : index
    %c0_118 = arith.constant 0 : index
    %c0_119 = arith.constant 0 : index
    %91 = vector.load %arg13[%c1_117, %c0_118, %c0_119] : memref<10x10x128xf32, #tpu.memory_space<vmem>>, vector<8x8x128xf32>
    %92 = vector.shape_cast %91 : vector<8x8x128xf32> to vector<64x128xf32>
    %c1_120 = arith.constant 1 : index
    %c0_121 = arith.constant 0 : index
    %c0_122 = arith.constant 0 : index
    %c0_123 = arith.constant 0 : index
    %93 = vector.load %arg5[%c1_120, %c0_121, %c0_122, %c0_123] : memref<3x3x128x128xf32, #tpu.memory_space<vmem>>, vector<1x1x128x128xf32>
    %94 = vector.shape_cast %93 : vector<1x1x128x128xf32> to vector<128x128xf32>
    %cst_124 = arith.constant dense<0.000000e+00> : vector<64x128xf32>
    %95 = tpu.matmul %92, %94, %cst_124 {dimension_numbers = #tpu.dot_dimension_numbers<[1], [0], [0], [1], [0, 0, 1, 1], [], []>} : vector<64x128xf32>, vector<128x128xf32>, vector<64x128xf32> -> vector<64x128xf32>
    %96 = arith.addf %90, %95 : vector<64x128xf32>
    %c1_125 = arith.constant 1 : index
    %c1_126 = arith.constant 1 : index
    %c0_127 = arith.constant 0 : index
    %97 = vector.load %arg13[%c1_125, %c1_126, %c0_127] : memref<10x10x128xf32, #tpu.memory_space<vmem>>, vector<8x8x128xf32>
    %98 = vector.shape_cast %97 : vector<8x8x128xf32> to vector<64x128xf32>
    %c1_128 = arith.constant 1 : index
    %c1_129 = arith.constant 1 : index
    %c0_130 = arith.constant 0 : index
    %c0_131 = arith.constant 0 : index
    %99 = vector.load %arg5[%c1_128, %c1_129, %c0_130, %c0_131] : memref<3x3x128x128xf32, #tpu.memory_space<vmem>>, vector<1x1x128x128xf32>
    %100 = vector.shape_cast %99 : vector<1x1x128x128xf32> to vector<128x128xf32>
    %cst_132 = arith.constant dense<0.000000e+00> : vector<64x128xf32>
    %101 = tpu.matmul %98, %100, %cst_132 {dimension_numbers = #tpu.dot_dimension_numbers<[1], [0], [0], [1], [0, 0, 1, 1], [], []>} : vector<64x128xf32>, vector<128x128xf32>, vector<64x128xf32> -> vector<64x128xf32>
    %102 = arith.addf %96, %101 : vector<64x128xf32>
    %c1_133 = arith.constant 1 : index
    %c2_134 = arith.constant 2 : index
    %c0_135 = arith.constant 0 : index
    %103 = vector.load %arg13[%c1_133, %c2_134, %c0_135] : memref<10x10x128xf32, #tpu.memory_space<vmem>>, vector<8x8x128xf32>
    %104 = vector.shape_cast %103 : vector<8x8x128xf32> to vector<64x128xf32>
    %c1_136 = arith.constant 1 : index
    %c2_137 = arith.constant 2 : index
    %c0_138 = arith.constant 0 : index
    %c0_139 = arith.constant 0 : index
    %105 = vector.load %arg5[%c1_136, %c2_137, %c0_138, %c0_139] : memref<3x3x128x128xf32, #tpu.memory_space<vmem>>, vector<1x1x128x128xf32>
    %106 = vector.shape_cast %105 : vector<1x1x128x128xf32> to vector<128x128xf32>
    %cst_140 = arith.constant dense<0.000000e+00> : vector<64x128xf32>
    %107 = tpu.matmul %104, %106, %cst_140 {dimension_numbers = #tpu.dot_dimension_numbers<[1], [0], [0], [1], [0, 0, 1, 1], [], []>} : vector<64x128xf32>, vector<128x128xf32>, vector<64x128xf32> -> vector<64x128xf32>
    %108 = arith.addf %102, %107 : vector<64x128xf32>
    %c2_141 = arith.constant 2 : index
    %c0_142 = arith.constant 0 : index
    %c0_143 = arith.constant 0 : index
    %109 = vector.load %arg13[%c2_141, %c0_142, %c0_143] : memref<10x10x128xf32, #tpu.memory_space<vmem>>, vector<8x8x128xf32>
    %110 = vector.shape_cast %109 : vector<8x8x128xf32> to vector<64x128xf32>
    %c2_144 = arith.constant 2 : index
    %c0_145 = arith.constant 0 : index
    %c0_146 = arith.constant 0 : index
    %c0_147 = arith.constant 0 : index
    %111 = vector.load %arg5[%c2_144, %c0_145, %c0_146, %c0_147] : memref<3x3x128x128xf32, #tpu.memory_space<vmem>>, vector<1x1x128x128xf32>
    %112 = vector.shape_cast %111 : vector<1x1x128x128xf32> to vector<128x128xf32>
    %cst_148 = arith.constant dense<0.000000e+00> : vector<64x128xf32>
    %113 = tpu.matmul %110, %112, %cst_148 {dimension_numbers = #tpu.dot_dimension_numbers<[1], [0], [0], [1], [0, 0, 1, 1], [], []>} : vector<64x128xf32>, vector<128x128xf32>, vector<64x128xf32> -> vector<64x128xf32>
    %114 = arith.addf %108, %113 : vector<64x128xf32>
    %c2_149 = arith.constant 2 : index
    %c1_150 = arith.constant 1 : index
    %c0_151 = arith.constant 0 : index
    %115 = vector.load %arg13[%c2_149, %c1_150, %c0_151] : memref<10x10x128xf32, #tpu.memory_space<vmem>>, vector<8x8x128xf32>
    %116 = vector.shape_cast %115 : vector<8x8x128xf32> to vector<64x128xf32>
    %c2_152 = arith.constant 2 : index
    %c1_153 = arith.constant 1 : index
    %c0_154 = arith.constant 0 : index
    %c0_155 = arith.constant 0 : index
    %117 = vector.load %arg5[%c2_152, %c1_153, %c0_154, %c0_155] : memref<3x3x128x128xf32, #tpu.memory_space<vmem>>, vector<1x1x128x128xf32>
    %118 = vector.shape_cast %117 : vector<1x1x128x128xf32> to vector<128x128xf32>
    %cst_156 = arith.constant dense<0.000000e+00> : vector<64x128xf32>
    %119 = tpu.matmul %116, %118, %cst_156 {dimension_numbers = #tpu.dot_dimension_numbers<[1], [0], [0], [1], [0, 0, 1, 1], [], []>} : vector<64x128xf32>, vector<128x128xf32>, vector<64x128xf32> -> vector<64x128xf32>
    %120 = arith.addf %114, %119 : vector<64x128xf32>
    %c2_157 = arith.constant 2 : index
    %c2_158 = arith.constant 2 : index
    %c0_159 = arith.constant 0 : index
    %121 = vector.load %arg13[%c2_157, %c2_158, %c0_159] : memref<10x10x128xf32, #tpu.memory_space<vmem>>, vector<8x8x128xf32>
    %122 = vector.shape_cast %121 : vector<8x8x128xf32> to vector<64x128xf32>
    %c2_160 = arith.constant 2 : index
    %c2_161 = arith.constant 2 : index
    %c0_162 = arith.constant 0 : index
    %c0_163 = arith.constant 0 : index
    %123 = vector.load %arg5[%c2_160, %c2_161, %c0_162, %c0_163] : memref<3x3x128x128xf32, #tpu.memory_space<vmem>>, vector<1x1x128x128xf32>
    %124 = vector.shape_cast %123 : vector<1x1x128x128xf32> to vector<128x128xf32>
    %cst_164 = arith.constant dense<0.000000e+00> : vector<64x128xf32>
    %125 = tpu.matmul %122, %124, %cst_164 {dimension_numbers = #tpu.dot_dimension_numbers<[1], [0], [0], [1], [0, 0, 1, 1], [], []>} : vector<64x128xf32>, vector<128x128xf32>, vector<64x128xf32> -> vector<64x128xf32>
    %126 = arith.addf %120, %125 : vector<64x128xf32>
    %c0_165 = arith.constant 0 : index
    %c0_166 = arith.constant 0 : index
    %127 = vector.load %arg6[%c0_165, %c0_166] : memref<1x128xf32, #tpu.memory_space<vmem>>, vector<1x128xf32>
    %128 = vector.broadcast %127 : vector<1x128xf32> to vector<64x128xf32>
    %129 = arith.mulf %126, %128 : vector<64x128xf32>
    %c0_167 = arith.constant 0 : index
    %c0_168 = arith.constant 0 : index
    %130 = vector.load %arg7[%c0_167, %c0_168] : memref<1x128xf32, #tpu.memory_space<vmem>>, vector<1x128xf32>
    %131 = vector.broadcast %130 : vector<1x128xf32> to vector<64x128xf32>
    %132 = arith.addf %129, %131 : vector<64x128xf32>
    %c1_169 = arith.constant 1 : index
    %c1_170 = arith.constant 1 : index
    %c0_171 = arith.constant 0 : index
    %133 = tpu.strided_load %arg12[%c1_169, %c1_170, %c0_171] {strides = array<i32: 2, 2, 1>} : memref<18x18x128xf32, #tpu.memory_space<vmem>>, vector<8x8x128xf32>
    %134 = vector.shape_cast %133 : vector<8x8x128xf32> to vector<64x128xf32>
    %c0_172 = arith.constant 0 : index
    %c0_173 = arith.constant 0 : index
    %135 = vector.load %arg8[%c0_172, %c0_173] : memref<128x128xf32, #tpu.memory_space<vmem>>, vector<128x128xf32>
    %cst_174 = arith.constant dense<0.000000e+00> : vector<64x128xf32>
    %136 = tpu.matmul %134, %135, %cst_174 {dimension_numbers = #tpu.dot_dimension_numbers<[1], [0], [0], [1], [0, 0, 1, 1], [], []>} : vector<64x128xf32>, vector<128x128xf32>, vector<64x128xf32> -> vector<64x128xf32>
    %c0_175 = arith.constant 0 : index
    %c0_176 = arith.constant 0 : index
    %137 = vector.load %arg9[%c0_175, %c0_176] : memref<1x128xf32, #tpu.memory_space<vmem>>, vector<1x128xf32>
    %138 = vector.broadcast %137 : vector<1x128xf32> to vector<64x128xf32>
    %139 = arith.mulf %136, %138 : vector<64x128xf32>
    %c0_177 = arith.constant 0 : index
    %c0_178 = arith.constant 0 : index
    %140 = vector.load %arg10[%c0_177, %c0_178] : memref<1x128xf32, #tpu.memory_space<vmem>>, vector<1x128xf32>
    %141 = vector.broadcast %140 : vector<1x128xf32> to vector<64x128xf32>
    %142 = arith.addf %139, %141 : vector<64x128xf32>
    %143 = arith.addf %132, %142 : vector<64x128xf32>
    %cst_179 = arith.constant 0.000000e+00 : f32
    %144 = vector.broadcast %cst_179 : f32 to vector<64x128xf32>
    %145 = arith.maximumf %143, %144 : vector<64x128xf32>
    %146 = vector.shape_cast %145 : vector<64x128xf32> to vector<8x8x128xf32>
    %c0_180 = arith.constant 0 : index
    %c0_181 = arith.constant 0 : index
    %c0_182 = arith.constant 0 : index
    %c0_183 = arith.constant 0 : index
    %147 = vector.load %arg11[%c0_180, %c0_181, %c0_182, %c0_183] : memref<1x8x8x128xf32, #tpu.memory_space<vmem>>, vector<1x8x8x128xf32>
    %148 = vector.shape_cast %147 : vector<1x8x8x128xf32> to vector<8x8x128xf32>
    %149 = vector.shape_cast %146 : vector<8x8x128xf32> to vector<1x8x8x128xf32>
    tpu.vector_store %arg11[%c0_180, %c0_181, %c0_182, %c0_183], %149 {strides = array<i32>} : memref<1x8x8x128xf32, #tpu.memory_space<vmem>>, vector<1x8x8x128xf32>,
    return
  }
  func.func @transform_0(%arg0: i32) -> (i32, i32, i32, i32) {
    %c0_i32 = arith.constant 0 : i32
    %c0_i32_0 = arith.constant 0 : i32
    %c0_i32_1 = arith.constant 0 : i32
    %c0_i32_2 = arith.constant 0 : i32
    return %arg0, %c0_i32, %c0_i32_0, %c0_i32_1 : i32, i32, i32, i32
  }
  func.func @transform_1(%arg0: i32) -> (i32, i32, i32, i32) {
    %c0_i32 = arith.constant 0 : i32
    %c0_i32_0 = arith.constant 0 : i32
    %c0_i32_1 = arith.constant 0 : i32
    %c0_i32_2 = arith.constant 0 : i32
    %c0_i32_3 = arith.constant 0 : i32
    return %c0_i32, %c0_i32_0, %c0_i32_1, %c0_i32_2 : i32, i32, i32, i32
  }
  func.func @transform_2(%arg0: i32) -> (i32, i32) {
    %c0_i32 = arith.constant 0 : i32
    %c0_i32_0 = arith.constant 0 : i32
    %c0_i32_1 = arith.constant 0 : i32
    return %c0_i32, %c0_i32_0 : i32, i32
  }
  func.func @transform_3(%arg0: i32) -> (i32, i32) {
    %c0_i32 = arith.constant 0 : i32
    %c0_i32_0 = arith.constant 0 : i32
    %c0_i32_1 = arith.constant 0 : i32
    return %c0_i32, %c0_i32_0 : i32, i32
  }
  func.func @transform_4(%arg0: i32) -> (i32, i32, i32, i32) {
    %c0_i32 = arith.constant 0 : i32
    %c0_i32_0 = arith.constant 0 : i32
    %c0_i32_1 = arith.constant 0 : i32
    %c0_i32_2 = arith.constant 0 : i32
    %c0_i32_3 = arith.constant 0 : i32
    return %c0_i32, %c0_i32_0, %c0_i32_1, %c0_i32_2 : i32, i32, i32, i32
  }
  func.func @transform_5(%arg0: i32) -> (i32, i32) {
    %c0_i32 = arith.constant 0 : i32
    %c0_i32_0 = arith.constant 0 : i32
    %c0_i32_1 = arith.constant 0 : i32
    return %c0_i32, %c0_i32_0 : i32, i32
  }
  func.func @transform_6(%arg0: i32) -> (i32, i32) {
    %c0_i32 = arith.constant 0 : i32
    %c0_i32_0 = arith.constant 0 : i32
    %c0_i32_1 = arith.constant 0 : i32
    return %c0_i32, %c0_i32_0 : i32, i32
  }
  func.func @transform_7(%arg0: i32) -> (i32, i32) {
    %c0_i32 = arith.constant 0 : i32
    %c0_i32_0 = arith.constant 0 : i32
    %c0_i32_1 = arith.constant 0 : i32
    return %c0_i32, %c0_i32_0 : i32, i32
  }
  func.func @transform_8(%arg0: i32) -> (i32, i32) {
    %c0_i32 = arith.constant 0 : i32
    %c0_i32_0 = arith.constant 0 : i32
    %c0_i32_1 = arith.constant 0 : i32
    return %c0_i32, %c0_i32_0 : i32, i32
  }
  func.func @transform_9(%arg0: i32) -> (i32, i32) {
    %c0_i32 = arith.constant 0 : i32
    %c0_i32_0 = arith.constant 0 : i32
    %c0_i32_1 = arith.constant 0 : i32
    return %c0_i32, %c0_i32_0 : i32, i32
  }
  func.func @transform_10(%arg0: i32) -> (i32, i32, i32, i32) {
    %c0_i32 = arith.constant 0 : i32
    %c0_i32_0 = arith.constant 0 : i32
    %c0_i32_1 = arith.constant 0 : i32
    %c0_i32_2 = arith.constant 0 : i32
    return %arg0, %c0_i32, %c0_i32_0, %c0_i32_1 : i32, i32, i32, i32
  }
}

</mosaic_0001>

<bundles_post_ra>
// kernel: tpu_custom_call.1
= control target key start
LH: loop header
LB: loop body
LE: loop exit
PB: predicated region body
PF: predicated region fallthrough
CT: control target
= control target key end

     0   :  { %s6495_s0 = inlined_call_operand.hbm [shape: f32[2,16,16,128], index: 0, kind: input, shape index: {}]   ;;  %s6496_s1 = inlined_call_operand.hbm [shape: f32[3,3,128,128], index: 1, kind: input, shape index: {}]   ;;  %s6497_s2 = inlined_call_operand.vmem [shape: f32[1,128], index: 2, kind: input, shape index: {}]   ;;  %s6498_s3 = inlined_call_operand.vmem [shape: f32[1,128], index: 3, kind: input, shape index: {}]   ;;  %s6499_s4 = inlined_call_operand.hbm [shape: f32[3,3,128,128], index: 4, kind: input, shape index: {}]   ;;  %s6500_s5 = inlined_call_operand.vmem [shape: f32[1,128], index: 5, kind: input, shape index: {}]   ;;  %s6501_s6 = inlined_call_operand.vmem [shape: f32[1,128], index: 6, kind: input, shape index: {}]   ;;  %s6502_s7 = inlined_call_operand.hbm [shape: f32[128,128], index: 7, kind: input, shape index: {}]   ;;  %s6503_s8 = inlined_call_operand.vmem [shape: f32[1,128], index: 8, kind: input, shape index: {}]   ;;  %s6504_s9 = inlined_call_operand.vmem [shape: f32[1,128], index: 9, kind: input, shape index: {}]   ;;  %s6505_s10 = inlined_call_operand.hbm [shape: f32[2,8,8,128], index: 10, kind: output, shape index: {}]  }
   0x1   :  { %6512 = sst [smem:[#allocation19_spill]] %s6501_s6 }
   0x2   :  { %6513 = sst [smem:[#allocation20_spill]] %s6505_s10 }
   0x3   :  { %15 = vsyncpa [#allocation5], 0 }
   0x4   :  { %17 = vsyncpa [#allocation5 + $0x1], 0 }
   0x5   :  { %18 = vsyncpa [#allocation8], 0 }
   0x6   :  { %19 = vsyncpa [#allocation11], 0 }
   0x7   :  { %20 = vsyncpa [#allocation6], 0 }
   0x8   :  { %22 = vsyncpa [#allocation6 + $0x1], 0  ;;  %s5914_s13 = smov 0   ;;  %s5916_s14 = smov 0  }
   0x9   :  { %s5918_s15 = smov 0   ;;  %s5920_s16 = smov 0  }
   0xa LB: > { %6514 = sst [smem:[#allocation17_spill]] %s5835_s13  ;;  %s5935_s17 = sadd.s32 4294967295, %s5847_s16   ;;  %s5847_s16 = sphi %s5920_s16, %s6540_s16   ;;  %s5843_s15 = sphi %s5918_s15, %s6539_s15   ;;  %s5839_s14 = sphi %s5916_s14, %s6538_s14   ;;  %s5835_s13 = sphi %s5914_s13, %s6537_s13  }
   0xb   : > { %s3504_s18 = sadd.s32 4294967294, %s5847_s16   ;;  %p48_p0 = scmp.ne.s32.totalorder %s5839_s14, %s5835_s13 }
   0xc   : > { %p6506_p1 = scmp.eq.s32.totalorder %s5935_s17, 0  ;;  %p267_p3 = scmp.eq.s32.totalorder %s3504_s18, 1 }
   0xd   : > { %p3505_p5 = scmp.ge.s32.totalorder %s5847_s16, 1  ;;  %p274_p7 = scmp.lt.s32.totalorder %s5847_s16, 3 }
   0xe   : > { %p5944_p4 = por %p6506_p1, %p48_p0  ;;  %p5949_p6 = por %p267_p3, %p48_p0 }
   0xf   : > { %p5954_p8 = pnand %p3505_p5, %p274_p7  ;;  %s5849_s22 = smov [#allocation7]  }
  0x10   : > { %s6515_s19 = scalar_select %p5944_p4, 1, 0 }
  0x11   : > { %s6516_s20 = scalar_select %p5949_p6, 1, 0 }
  0x12   : > { %s6518_s21 = scalar_select %p5954_p8, 1, 0 }
  0x13   : > { %6517 = sst [smem:[#allocation18_spill]] %s6516_s20  ;;  %s286_s23 = sshll.u32 %s5849_s22, 4  ;;  %s5958_s23 = int_to_ptr.vmem [resolvable:$true] %s286_s23 }
  0x14   : > { %p5592_p9 = pneg %p5954_p8  ;;  %s5850_s25 = smov [#allocation9]  }
  0x15   : > { %s305_s26 = sshll.u32 %s5850_s25, 4  ;;  %s5851_s27 = smov [#allocation10]   ;;  %s5969_s26 = int_to_ptr.vmem [resolvable:$true] %s305_s26 }
  0x16   : > { %p5965_p11 = pnand %p5592_p9, %p6506_p1  ;;  %s5971_s28 = sshll.u32 %s5851_s27, 4  ;;  %s325_s28 = int_to_ptr.vmem [resolvable:$true] %s5971_s28 }
  0x17   : > { %s5659_s11 = scalar_lea.hbm %s6496_s1, 18432 }
  0x18   : > { %p5660_p12 = scmp.ne.s32.totalorder %s6496_s1, %s5659_s11  ;;  %p5981_p13 = pneg %p5965_p11 }
  0x19   : > { %p5666_p5 = scmp.lt.u32.totalorder %s5659_s11, %s6496_s1 }
  0x1a   : > { %p5662_p0 = pnand %p5981_p13, %p5660_p12 }
  0x1c   : > { %p5663_p3 = pneg %p5662_p0 }
  0x1e   : > { %p5668_p7 = pnand %p5666_p5, %p5663_p3 }
  0x20   : > { %5671 = shalt.err (!%p5668_p7)
}
  0x21   : > { %s5672_s29 = scalar_lea.vmem %s5958_s23, 18432  ;;  %p5680_p2 = scmp.lt.s32.totalorder %s5958_s23, %s5958_s23 }
  0x22   : > { %p5673_p9 = scmp.ne.s32.totalorder %s5958_s23, %s5672_s29  ;;  %p5681_p6 = scmp.lt.s32.totalorder %s5672_s29, %s5672_s29 }
  0x24   : > { %p5675_p10 = pnand %p5673_p9, %p5981_p13  ;;  %p5682_p12 = por %p5681_p6, %p5680_p2 }
  0x26   : > { %p5676_p1 = pneg %p5675_p10 }
  0x28   : > { %p5683_p0 = pnand %p5682_p12, %p5676_p1 }
  0x2a   : > { %5686 = shalt.err (!%p5683_p0)
}
  0x2b   : > { %s5852_s30 = smov 128   ;;  %s5853_s11 = smov 8  }
  0x2c   : > { %5595 = dma.hbm_to_vmem [thread:$0]  (!%p5965_p11), %s6496_s1, 18432, %s5958_s23, [#allocation8], %s5852_s30, %s5852_s30, %s5853_s11  }
  0x2d   : > { %s5687_s29 = scalar_lea.hbm %s6499_s4, 18432 }
  0x2e   : > { %p5688_p1 = scmp.ne.s32.totalorder %s6499_s4, %s5687_s29  ;;  %p5694_p10 = scmp.lt.u32.totalorder %s5687_s29, %s6499_s4 }
  0x30   : > { %p5690_p2 = pnand %p5688_p1, %p5981_p13 }
  0x32   : > { %p5691_p6 = pneg %p5690_p2 }
  0x34   : > { %p5696_p3 = pnand %p5694_p10, %p5691_p6 }
  0x36   : > { %5699 = shalt.err (!%p5696_p3)
}
  0x37   : > { %s5700_s23 = scalar_lea.vmem %s5969_s26, 18432  ;;  %p5708_p12 = scmp.lt.s32.totalorder %s5969_s26, %s5969_s26 }
  0x38   : > { %p5701_p5 = scmp.ne.s32.totalorder %s5969_s26, %s5700_s23  ;;  %p5709_p0 = scmp.lt.s32.totalorder %s5700_s23, %s5700_s23 }
  0x3a   : > { %p5703_p7 = pnand %p5701_p5, %p5981_p13  ;;  %p5710_p1 = por %p5709_p0, %p5708_p12 }
  0x3c   : > { %p5704_p9 = pneg %p5703_p7 }
  0x3e   : > { %p5711_p2 = pnand %p5710_p1, %p5704_p9 }
  0x40   : > { %5714 = shalt.err (!%p5711_p2)
}
  0x41   : > { %5598 = dma.hbm_to_vmem [thread:$0]  (!%p5965_p11), %s6499_s4, 18432, %s5969_s26, [#allocation8], %s5852_s30, %s5852_s30, %s5853_s11  }
  0x42   : > { %s5715_s12 = scalar_lea.hbm %s6502_s7, 2048 }
  0x43   : > { %p5716_p6 = scmp.ne.s32.totalorder %s6502_s7, %s5715_s12  ;;  %p5722_p5 = scmp.lt.u32.totalorder %s5715_s12, %s6502_s7 }
  0x45   : > { %p5718_p10 = pnand %p5716_p6, %p5981_p13 }
  0x47   : > { %p5719_p3 = pneg %p5718_p10 }
  0x49   : > { %p5724_p7 = pnand %p5722_p5, %p5719_p3 }
  0x4b   : > { %5727 = shalt.err (!%p5724_p7)
}
  0x4c   : > { %s5728_s23 = scalar_lea.vmem %s325_s28, 2048  ;;  %p5736_p1 = scmp.lt.s32.totalorder %s325_s28, %s325_s28 }
  0x4d   : > { %p5729_p9 = scmp.ne.s32.totalorder %s325_s28, %s5728_s23  ;;  %p5737_p2 = scmp.lt.s32.totalorder %s5728_s23, %s5728_s23 }
  0x4f   : > { %p5731_p12 = pnand %p5729_p9, %p5981_p13  ;;  %p5738_p4 = por %p5737_p2, %p5736_p1 }
  0x51   : > { %p5732_p0 = pneg %p5731_p12 }
  0x53   : > { %p5739_p8 = pnand %p5738_p4, %p5732_p0 }
  0x55   : > { %5742 = shalt.err (!%p5739_p8)
}
  0x56   : > { %5601 = dma.hbm_to_vmem [thread:$0]  (!%p5965_p11), %s6502_s7, 2048, %s325_s28, [#allocation11], %s5852_s30, %s5852_s30, %s5853_s11  }
  0x57   : > { %s6054_s22 = sadd.s32 1, %s5847_s16   ;;  %s35_s10 = sadd.s32 1, %s5843_s15 }
  0x58   : > { %s32_s24 = ssub.s32 %s5847_s16, %s6054_s22  ;;  %p42_p8 = scmp.ne.s32.totalorder %s5843_s15, %s5839_s14 }
  0x59   : > { %p33_p4 = scmp.eq.s32.totalorder %s32_s24, 0  ;;  %p43_p13 = scmp.eq.s32.totalorder %s5847_s16, 0 }
  0x5a   : > { %p5613_p6 = scmp.lt.s32.totalorder %s5847_s16, 2  ;;  %p6521_p3 = scmp.eq.s32.totalorder %s5935_s17, 1 }
  0x5b   : > { %s6064_s13 = scalar_select %p33_p4, %s5843_s15, %s35_s10  }
  0x5c   : > { %p44_p10 = por %p43_p13, %p42_p8  ;;  %p6068_p5 = por %p6521_p3, %p42_p8 }
  0x5d   : > { %s344_s12 = sand.u32 1, %s5843_s15   ;;  %s3530_s18 = sshll.u32 %s5847_s16, 12 }
  0x5e   : > { %s3510_s28 = sshll.u32 %s344_s12, 8  ;;  %s6077_s29 = scalar_lea.hbm %s6495_s0, %s3530_s18 }
  0x5f   : > { %s348_s23 = scalar_lea.vmem [#allocation4], %s3510_s28  ;;  %p6079_p11 = pnand %p5613_p6, %p44_p10 }
  0x60   : > { %s355_s26 = sshll.u32 %s348_s23, 4  ;;  %s6085_s24 = scalar_lea.sflag [#allocation5], %s344_s12  ;;  %s6083_s26 = int_to_ptr.vmem [resolvable:$true] %s355_s26 }
  0x61   : > { %s5743_s10 = scalar_lea.hbm %s6077_s29, 4096  ;;  %p5745_p9 = pneg %p6079_p11 }
  0x62   : > { %p5744_p7 = scmp.ne.s32.totalorder %s6077_s29, %s5743_s10  ;;  %s5748_s25 = scalar_lea.hbm %s6495_s0, 8192 }
  0x63   : > { %p5749_p1 = scmp.lt.u32.totalorder %s6077_s29, %s6495_s0  ;;  %p5750_p2 = scmp.lt.u32.totalorder %s5748_s25, %s5743_s10 }
  0x64   : > { %p5746_p12 = pnand %p5745_p9, %p5744_p7  ;;  %p5752_p8 = scmp.lt.u32.totalorder %s5743_s10, %s6077_s29 }
  0x65   : > { %p5751_p4 = por %p5750_p2, %p5749_p1 }
  0x66   : > { %p5747_p0 = pneg %p5746_p12 }
  0x67   : > { %p5753_p13 = por %p5752_p8, %p5751_p4 }
  0x69   : > { %p5754_p6 = pnand %p5753_p13, %p5747_p0 }
  0x6b   : > { %5757 = shalt.err (!%p5754_p6)
}
  0x6c   : > { %s5758_s12 = scalar_lea.vmem %s6083_s26, 4096  ;;  %s5854_s18 = smov [#allocation4]  }
  0x6d   : > { %p5759_p10 = scmp.ne.s32.totalorder %s6083_s26, %s5758_s12  ;;  %s5763_s28 = sshll.u32 %s5854_s18, 4  ;;  %s5764_s28 = int_to_ptr.vmem [resolvable:$false] %s5763_s28 }
  0x6e   : > { %s5765_s27 = scalar_lea.vmem %s5764_s28, 8192  ;;  %p5766_p12 = scmp.lt.s32.totalorder %s6083_s26, %s5764_s28 }
  0x6f   : > { %p5761_p3 = pnand %p5759_p10, %p5745_p9  ;;  %p5767_p1 = scmp.lt.s32.totalorder %s5765_s27, %s5758_s12 }
  0x71   : > { %p5762_p7 = pneg %p5761_p3  ;;  %p5768_p2 = por %p5767_p1, %p5766_p12 }
  0x73   : > { %p5769_p4 = pnand %p5768_p2, %p5762_p7 }
  0x75   : > { %5772 = shalt.err (!%p5769_p4)
}
  0x76   : > { %5605 = dma.hbm_to_vmem [thread:$0]  (!%p6079_p11), %s6077_s29, 4096, %s6083_s26, %s6085_s24, %s5852_s30, %s5852_s30, %s5853_s11  }
  0x77   : > { %p6524_p9 = scmp.ne.s32.totalorder %s6518_s21, 0 }
  0x78   : > { %s6119_s10 = sand.u32 (!%p6524_p9), 1, %s5839_s14   ;;  %p6525_p0 = scmp.ne.s32.totalorder (!%p6524_p9), %s6515_s19, 0 }
  0x79   : > { %367 = sbr.rel (%p6524_p9) target bundleno = 1184 (0x4a0), region = 60  ;;  %s3514_s25 = sshll.u32 (!%p6524_p9), %s6119_s10, 8 }
  0x7a   : > { %s370_s23 = scalar_lea.sflag (!%p6524_p9), [#allocation5], %s6119_s10  ;;  %s6123_s12 = scalar_lea.vmem (!%p6524_p9), [#allocation4], %s3514_s25 }
  0x80   : > { %5818 = dma.done.wait (%p6525_p0), %s370_s23, 4096  }
  0x81   : > { %5820 = vsyncadd (%p6525_p0), %s370_s23, 4294963200  ;;  %p6526_p11 = scmp.eq.s32.totalorder %s5935_s17, 0 }
  0x83   : > { %5822 = dma.done.wait (%p6526_p11), [#allocation8], 36864   ;;  %p6527_p8 = pmov %p6526_p11 }
  0x85   : > { %5824 = vsyncadd (%p6527_p8), [#allocation8], 4294930432  ;;  %p6528_p13 = pmov %p6527_p8 }
  0x86   : > { %p6529_p6 = pmov %p6527_p8 }
  0x87   : > { %5826 = dma.done.wait (%p6528_p13), [#allocation11], 2048  }
  0x88   : > { %5828 = vsyncadd (%p6529_p6), [#allocation11], 4294965248  ;;  %v5855_v0 = vmov 0.0   ;;  %v589_v1 = vld [vmem:[#allocation7 + $0x80] sm:$0xff]  ;;  %v590_v2 = vld [vmem:[#allocation7 + $0x88] sm:$0xff]  ;;  %s6530_s23 = sld [smem:[#allocation19_spill]] }
  0x89   : > { %473 = vst [vmem:[#allocation2 + $0x198] sm:$0xff] %v5855_v0  ;;  %422 = vst [vmem:[#allocation2] sm:$0xff] %v5855_v0  ;;  %v591_v3 = vld [vmem:[#allocation7 + $0x90] sm:$0xff]  ;;  %v4824_v4 = vpack.c.bf16 %v590_v2, %v589_v1  ;;  %v592_v5 = vld [vmem:[#allocation7 + $0x98] sm:$0xff]  ;;  %s3531_s21 = sshll.u32 %s5935_s17, 10  ;;  %s6531_s26 = sld [smem:[#allocation20_spill]] }
  0x8a   : > { %423 = vst [vmem:[#allocation2 + $0x8] sm:$0xff] %v5855_v0  ;;  %424 = vst [vmem:[#allocation2 + $0x10] sm:$0x3] %v5855_v0  ;;  %v4828_v6 = vpack.c.bf16 %v592_v5, %v591_v3  ;;  %v593_v7 = vld [vmem:[#allocation7 + $0xa0] sm:$0xff]  ;;  %v594_v8 = vld [vmem:[#allocation7 + $0xa8] sm:$0xff]  ;;  %s3343_s17 = scalar_lea.sflag [#allocation6], %s6119_s10 }
  0x8b   : > { %425 = vst [vmem:[#allocation2 + $0x18] sm:$0xff] %v5855_v0  ;;  %426 = vst [vmem:[#allocation2 + $0x20] sm:$0xff] %v5855_v0  ;;  %4825 = vmatprep.subr.bf16.mxu0 %v4824_v4  ;;  %v4832_v9 = vpack.c.bf16 %v594_v8, %v593_v7  ;;  %v595_v10 = vld [vmem:[#allocation7 + $0xb0] sm:$0xff]  ;;  %v596_v12 = vld [vmem:[#allocation7 + $0xb8] sm:$0xff]  ;;  %s5856_s18 = smov [#allocation12]  }
  0x8c   : > { %427 = vst [vmem:[#allocation2 + $0x28] sm:$0x3] %v5855_v0  ;;  %428 = vst [vmem:[#allocation2 + $0x30] sm:$0xff] %v5855_v0  ;;  %4827 = vmatpush3.bf16.msra.mxu0 %v4824_v4  ;;  %v478_v13 = vld [vmem:[%s6123_s12 + $0x10] sm:$0xff]  ;;  %v479_v14 = vld [vmem:[%s6123_s12 + $0x18] sm:$0xff]  ;;  %v4836_v15 = vpack.c.bf16 %v596_v12, %v595_v10  ;;  %s5777_s28 = sshll.u32 %s5856_s18, 4  ;;  %s5778_s28 = int_to_ptr.vmem [resolvable:$false] %s5777_s28 }
  0x8d   : > { %429 = vst [vmem:[#allocation2 + $0x38] sm:$0xff] %v5855_v0  ;;  %430 = vst [vmem:[#allocation2 + $0x40] sm:$0x3] %v5855_v0  ;;  %4829 = vmatprep.subr.bf16.mxu0 %v4828_v6  ;;  %v482_v16 = vld [vmem:[%s6123_s12 + $0x30] sm:$0xff]  ;;  %v597_v17 = vld [vmem:[#allocation7 + $0xc0] sm:$0xff]  ;;  %s5779_s27 = scalar_lea.vmem %s5778_s28, 2048 }
  0x8e   : > { %431 = vst [vmem:[#allocation2 + $0x48] sm:$0xff] %v5855_v0  ;;  %432 = vst [vmem:[#allocation2 + $0x50] sm:$0xff] %v5855_v0  ;;  %v598_v18 = vld [vmem:[#allocation7 + $0xc8] sm:$0xff]  ;;  %v483_v19 = vld [vmem:[%s6123_s12 + $0x38] sm:$0xff] }
  0x8f   : > { %433 = vst [vmem:[#allocation2 + $0x58] sm:$0x3] %v5855_v0  ;;  %434 = vst [vmem:[#allocation2 + $0x60] sm:$0xff] %v5855_v0  ;;  %v486_v20 = vld [vmem:[%s6123_s12 + $0x50] sm:$0xff]  ;;  %v487_v21 = vld [vmem:[%s6123_s12 + $0x58] sm:$0xff]  ;;  %v4840_v24 = vpack.c.bf16 %v598_v18, %v597_v17  ;;  %s6447_s6 = scalar_lea.hbm %s6531_s26, %s3531_s21 }
  0x90   : > { %435 = vst [vmem:[#allocation2 + $0x68] sm:$0xff] %v5855_v0  ;;  %436 = vst [vmem:[#allocation2 + $0x70] sm:$0x3] %v5855_v0  ;;  %4831 = vmatpush3.bf16.msra.mxu0 %v4828_v6  ;;  %v490_v22 = vld [vmem:[%s6123_s12 + $0x70] sm:$0xff]  ;;  %v491_v23 = vld [vmem:[%s6123_s12 + $0x78] sm:$0xff] }
  0x91   : > { %437 = vst [vmem:[#allocation2 + $0x78] sm:$0xff] %v5855_v0  ;;  %438 = vst [vmem:[#allocation2 + $0x80] sm:$0xff] %v5855_v0  ;;  %v573_v11 = vld [vmem:[#allocation2 + $0x1] ss:$2 sm:$0xff]  ;;  %4833 = vmatprep.subr.bf16.mxu0 %v4832_v9  ;;  %v601_v34 = vld [vmem:[#allocation7 + $0xe0] sm:$0xff] }
  0x92   : > { %439 = vst [vmem:[#allocation2 + $0x88] sm:$0x3] %v5855_v0  ;;  %440 = vst [vmem:[#allocation2 + $0x90] sm:$0xff] %v5855_v0  ;;  %4020 = vmatprep.mubr.f32.mxu0 %v573_v11  ;;  %v494_v25 = vld [vmem:[%s6123_s12 + $0x90] sm:$0xff]  ;;  %v495_v26 = vld [vmem:[%s6123_s12 + $0x98] sm:$0xff] }
  0x93   : > { %441 = vst [vmem:[#allocation2 + $0x98] sm:$0xff] %v5855_v0  ;;  %442 = vst [vmem:[#allocation2 + $0xa0] sm:$0x3] %v5855_v0  ;;  %v498_v27 = vld [vmem:[%s6123_s12 + $0xb0] sm:$0xff]  ;;  %v600_v29 = vld [vmem:[#allocation7 + $0xd8] sm:$0xff] }
  0x94   : > { %443 = vst [vmem:[#allocation2 + $0xa8] sm:$0xff] %v5855_v0  ;;  %444 = vst [vmem:[#allocation2 + $0xb0] sm:$0xff] %v5855_v0  ;;  %4835 = vmatpush3.bf16.msra.mxu0 %v4832_v9  ;;  %v599_v28 = vld [vmem:[#allocation7 + $0xd0] sm:$0xff]  ;;  %v499_v30 = vld [vmem:[%s6123_s12 + $0xb8] sm:$0xff] }
  0x95   : > { %445 = vst [vmem:[#allocation2 + $0xb8] sm:$0x3] %v5855_v0  ;;  %446 = vst [vmem:[#allocation2 + $0xc0] sm:$0xff] %v5855_v0  ;;  %4837 = vmatprep.subr.bf16.mxu0 %v4836_v15  ;;  %v502_v31 = vld [vmem:[%s6123_s12 + $0xd0] sm:$0xff]  ;;  %v503_v32 = vld [vmem:[%s6123_s12 + $0xd8] sm:$0xff]  ;;  %v4844_v33 = vpack.c.bf16 %v600_v29, %v599_v28 }
  0x96   : > { %447 = vst [vmem:[#allocation2 + $0xc8] sm:$0xff] %v5855_v0  ;;  %448 = vst [vmem:[#allocation2 + $0xd0] sm:$0x3] %v5855_v0  ;;  %v602_v35 = vld [vmem:[#allocation7 + $0xe8] sm:$0xff]  ;;  %v603_v37 = vld [vmem:[#allocation7 + $0xf0] sm:$0xff] }
  0x97   : > { %449 = vst [vmem:[#allocation2 + $0xd8] sm:$0xff] %v5855_v0  ;;  %450 = vst [vmem:[#allocation2 + $0xe0] sm:$0xff] %v5855_v0  ;;  %v4848_v36 = vpack.c.bf16 %v602_v35, %v601_v34  ;;  %v604_v38 = vld [vmem:[#allocation7 + $0xf8] sm:$0xff]  ;;  %v556_v40 = vld [vmem:[#allocation7] sm:$0xff] }
  0x98   : > { %451 = vst [vmem:[#allocation2 + $0xe8] sm:$0x3] %v5855_v0  ;;  %452 = vst [vmem:[#allocation2 + $0xf0] sm:$0xff] %v5855_v0  ;;  %4839 = vmatpush3.bf16.msra.mxu0 %v4836_v15  ;;  %v4852_v39 = vpack.c.bf16 %v604_v38, %v603_v37  ;;  %v557_v41 = vld [vmem:[#allocation7 + $0x8] sm:$0xff]  ;;  %v558_v43 = vld [vmem:[#allocation7 + $0x10] sm:$0xff] }
  0x99   : > { %453 = vst [vmem:[#allocation2 + $0xf8] sm:$0xff] %v5855_v0  ;;  %454 = vst [vmem:[#allocation2 + $0x100] sm:$0x3] %v5855_v0  ;;  %4841 = vmatprep.subr.bf16.mxu0 %v4840_v24  ;;  %v4856_v42 = vpack.c.bf16 %v557_v41, %v556_v40  ;;  %v559_v44 = vld [vmem:[#allocation7 + $0x18] sm:$0xff]  ;;  %v560_v47 = vld [vmem:[#allocation7 + $0x20] sm:$0xff] }
  0x9a   : > { %455 = vst [vmem:[#allocation2 + $0x108] sm:$0xff] %v5855_v0  ;;  %456 = vst [vmem:[#allocation2 + $0x110] sm:$0xff] %v5855_v0  ;;  %v4860_v46 = vpack.c.bf16 %v559_v44, %v558_v43  ;;  %v561_v49 = vld [vmem:[#allocation7 + $0x28] sm:$0xff]  ;;  %v476_v50 = vld [vmem:[%s6123_s12] sm:$0xff] }
  0x9b   : > { %457 = vst [vmem:[#allocation2 + $0x118] sm:$0x3] %v5855_v0  ;;  %458 = vst [vmem:[#allocation2 + $0x120] sm:$0xff] %v5855_v0  ;;  %v477_v51 = vld [vmem:[%s6123_s12 + $0x8] sm:$0xff]  ;;  %v480_v52 = vld [vmem:[%s6123_s12 + $0x20] sm:$0xff]  ;;  %v4864_v55 = vpack.c.bf16 %v561_v49, %v560_v47 }
  0x9c   : > { %459 = vst [vmem:[#allocation2 + $0x128] sm:$0xff] %v5855_v0  ;;  %460 = vst [vmem:[#allocation2 + $0x130] sm:$0x3] %v5855_v0  ;;  %4843 = vmatpush3.bf16.msra.mxu0 %v4840_v24  ;;  %v481_v53 = vld [vmem:[%s6123_s12 + $0x28] sm:$0xff]  ;;  %v562_v57 = vld [vmem:[#allocation7 + $0x30] sm:$0xff] }
  0x9d   : > { %461 = vst [vmem:[#allocation2 + $0x138] sm:$0xff] %v5855_v0  ;;  %462 = vst [vmem:[#allocation2 + $0x140] sm:$0xff] %v5855_v0  ;;  %4845 = vmatprep.subr.bf16.mxu0 %v4844_v33  ;;  %v563_v58 = vld [vmem:[#allocation7 + $0x38] sm:$0xff]  ;;  %v484_v59 = vld [vmem:[%s6123_s12 + $0x40] sm:$0xff] }
  0x9e   : > { %463 = vst [vmem:[#allocation2 + $0x148] sm:$0x3] %v5855_v0  ;;  %464 = vst [vmem:[#allocation2 + $0x150] sm:$0xff] %v5855_v0  ;;  %v485_v61 = vld [vmem:[%s6123_s12 + $0x48] sm:$0xff]  ;;  %v488_v62 = vld [vmem:[%s6123_s12 + $0x60] sm:$0xff]  ;;  %v4868_v1 = vpack.c.bf16 %v563_v58, %v562_v57 }
  0x9f   : > { %465 = vst [vmem:[#allocation2 + $0x158] sm:$0xff] %v5855_v0  ;;  %466 = vst [vmem:[#allocation2 + $0x160] sm:$0x3] %v5855_v0  ;;  %v489_v63 = vld [vmem:[%s6123_s12 + $0x68] sm:$0xff]  ;;  %v564_v2 = vld [vmem:[#allocation7 + $0x40] sm:$0xff] }
  0xa0   : > { %467 = vst [vmem:[#allocation2 + $0x168] sm:$0xff] %v5855_v0  ;;  %468 = vst [vmem:[#allocation2 + $0x170] sm:$0xff] %v5855_v0  ;;  %4847 = vmatpush3.bf16.msra.mxu0 %v4844_v33  ;;  %v493_v4 = vld [vmem:[%s6123_s12 + $0x88] sm:$0xff]  ;;  %v496_v6 = vld [vmem:[%s6123_s12 + $0xa0] sm:$0xff] }
  0xa1   : > { %469 = vst [vmem:[#allocation2 + $0x178] sm:$0x3] %v5855_v0  ;;  %470 = vst [vmem:[#allocation2 + $0x180] sm:$0xff] %v5855_v0  ;;  %4849 = vmatprep.subr.bf16.mxu0 %v4848_v36  ;;  %v565_v5 = vld [vmem:[#allocation7 + $0x48] sm:$0xff]  ;;  %v500_v8 = vld [vmem:[%s6123_s12 + $0xc0] sm:$0xff] }
  0xa2   : > { %471 = vst [vmem:[#allocation2 + $0x188] sm:$0xff] %v5855_v0  ;;  %472 = vst [vmem:[#allocation2 + $0x190] sm:$0x3] %v5855_v0  ;;  %v497_v7 = vld [vmem:[%s6123_s12 + $0xa8] sm:$0xff]  ;;  %v504_v11 = vld [vmem:[%s6123_s12 + $0xe0] sm:$0xff]  ;;  %v4872_v12 = vpack.c.bf16 %v565_v5, %v564_v2 }
  0xa3   : > { %1874 = vst [vmem:[#allocation3] sm:$0xff] %v5855_v0  ;;  %1875 = vst [vmem:[#allocation3 + $0x8] sm:$0x3] %v5855_v0  ;;  %v501_v9 = vld [vmem:[%s6123_s12 + $0xc8] sm:$0xff]  ;;  %v566_v15 = vld [vmem:[#allocation7 + $0x50] sm:$0xff] }
  0xa4   : > { %1876 = vst [vmem:[#allocation3 + $0x10] sm:$0xff] %v5855_v0  ;;  %1877 = vst [vmem:[#allocation3 + $0x18] sm:$0x3] %v5855_v0  ;;  %4851 = vmatpush3.bf16.msra.mxu0 %v4848_v36  ;;  %v568_v18 = vld [vmem:[#allocation7 + $0x60] sm:$0xff]  ;;  %v835_v28 = vld [vmem:[#allocation7 + $0x118] sm:$0xff] }
  0xa5   : > { %1878 = vst [vmem:[#allocation3 + $0x20] sm:$0xff] %v5855_v0  ;;  %1879 = vst [vmem:[#allocation3 + $0x28] sm:$0x3] %v5855_v0  ;;  %4853 = vmatprep.subr.bf16.mxu0 %v4852_v39  ;;  %v832_v24 = vld [vmem:[#allocation7 + $0x100] sm:$0xff]  ;;  %v837_v33 = vld [vmem:[#allocation7 + $0x128] sm:$0xff] }
  0xa6   : > { %1880 = vst [vmem:[#allocation3 + $0x30] sm:$0xff] %v5855_v0  ;;  %1881 = vst [vmem:[#allocation3 + $0x38] sm:$0x3] %v5855_v0  ;;  %v838_v37 = vld [vmem:[#allocation7 + $0x130] sm:$0xff]  ;;  %v839_v38 = vld [vmem:[#allocation7 + $0x138] sm:$0xff] }
  0xa7   : > { %1882 = vst [vmem:[#allocation3 + $0x40] sm:$0xff] %v5855_v0  ;;  %1883 = vst [vmem:[#allocation3 + $0x48] sm:$0x3] %v5855_v0  ;;  %v4900_v40 = vpack.c.bf16 %v839_v38, %v838_v37  ;;  %v841_v43 = vld [vmem:[#allocation7 + $0x148] sm:$0xff]  ;;  %v842_v47 = vld [vmem:[#allocation7 + $0x150] sm:$0xff] }
  0xa8   : > { %1884 = vst [vmem:[#allocation3 + $0x50] sm:$0xff] %v5855_v0  ;;  %1885 = vst [vmem:[#allocation3 + $0x58] sm:$0x3] %v5855_v0  ;;  %4855 = vmatpush3.bf16.msra.mxu0 %v4852_v39  ;;  %v978_v57 = vld [vmem:[#allocation7 + $0x188] sm:$0xff]  ;;  %v983_v5 = vld [vmem:[#allocation7 + $0x1b0] sm:$0xff] }
  0xa9   : > { %1886 = vst [vmem:[#allocation3 + $0x60] sm:$0xff] %v5855_v0  ;;  %1887 = vst [vmem:[#allocation3 + $0x68] sm:$0x3] %v5855_v0  ;;  %4857 = vmatprep.subr.bf16.mxu0 %v4856_v42 }
  0xaa   : > { %1888 = vst [vmem:[#allocation3 + $0x70] sm:$0xff] %v5855_v0  ;;  %1889 = vst [vmem:[#allocation3 + $0x78] sm:$0x3] %v5855_v0 }
  0xab   : > { %1890 = vst [vmem:[#allocation3 + $0x80] sm:$0xff] %v5855_v0  ;;  %1891 = vst [vmem:[#allocation3 + $0x88] sm:$0x3] %v5855_v0 }
  0xac   : > { %1892 = vst [vmem:[#allocation3 + $0x90] sm:$0xff] %v5855_v0  ;;  %1893 = vst [vmem:[#allocation3 + $0x98] sm:$0x3] %v5855_v0  ;;  %v492_v0 = vld [vmem:[%s6123_s12 + $0x80] sm:$0xff] }
  0xad   : > { %511 = vst [vmem:[#allocation2 + $0x31] sm:$0xff] %v478_v13  ;;  %512 = vst [vmem:[#allocation2 + $0x39] sm:$0xff] %v479_v14  ;;  %v541_v13 = vld [vmem:[#allocation2] ss:$2 sm:$0xff]  ;;  %v505_v14 = vld [vmem:[%s6123_s12 + $0xe8] sm:$0xff] }
  0xae   : > { %515 = vst [vmem:[#allocation2 + $0x61] sm:$0xff] %v482_v16  ;;  %516 = vst [vmem:[#allocation2 + $0x69] sm:$0xff] %v483_v19  ;;  %v567_v16 = vld [vmem:[#allocation7 + $0x58] sm:$0xff]  ;;  %v569_v19 = vld [vmem:[#allocation7 + $0x68] sm:$0xff] }
  0xaf   : > { %519 = vst [vmem:[#allocation2 + $0x91] sm:$0xff] %v486_v20  ;;  %520 = vst [vmem:[#allocation2 + $0x99] sm:$0xff] %v487_v21  ;;  %v4876_v17 = vpack.c.bf16 %v567_v16, %v566_v15  ;;  %v4880_v20 = vpack.c.bf16 %v569_v19, %v568_v18  ;;  %v570_v21 = vld [vmem:[#allocation7 + $0x70] sm:$0xff]  ;;  %v988_v16 = vld [vmem:[#allocation7 + $0x1d8] sm:$0xff] }
  0xb0   : > { %523 = vst [vmem:[#allocation2 + $0xc1] sm:$0xff] %v490_v22  ;;  %524 = vst [vmem:[#allocation2 + $0xc9] sm:$0xff] %v491_v23  ;;  %v571_v22 = vld [vmem:[#allocation7 + $0x78] sm:$0xff]  ;;  %v987_v15 = vld [vmem:[#allocation7 + $0x1d0] sm:$0xff] }
  0xb1   : > { %527 = vst [vmem:[#allocation2 + $0xf1] sm:$0xff] %v494_v25  ;;  %528 = vst [vmem:[#allocation2 + $0xf9] sm:$0xff] %v495_v26  ;;  %v4884_v23 = vpack.c.bf16 %v571_v22, %v570_v21  ;;  %v833_v25 = vld [vmem:[#allocation7 + $0x108] sm:$0xff]  ;;  %v989_v18 = vld [vmem:[#allocation7 + $0x1e0] sm:$0xff] }
  0xb2   : > { %531 = vst [vmem:[#allocation2 + $0x121] sm:$0xff] %v498_v27  ;;  %532 = vst [vmem:[#allocation2 + $0x129] sm:$0xff] %v499_v30  ;;  %v4888_v26 = vpack.c.bf16 %v833_v25, %v832_v24  ;;  %v834_v27 = vld [vmem:[#allocation7 + $0x110] sm:$0xff]  ;;  %v990_v19 = vld [vmem:[#allocation7 + $0x1e8] sm:$0xff] }
  0xb3   : > { %535 = vst [vmem:[#allocation2 + $0x151] sm:$0xff] %v502_v31  ;;  %536 = vst [vmem:[#allocation2 + $0x159] sm:$0xff] %v503_v32  ;;  %v4892_v30 = vpack.c.bf16 %v835_v28, %v834_v27  ;;  %v836_v32 = vld [vmem:[#allocation7 + $0x120] sm:$0xff]  ;;  %v991_v21 = vld [vmem:[#allocation7 + $0x1f0] sm:$0xff] }
  0xb4   : > { %v575_v45 = vld [vmem:[#allocation2 + $0x31] ss:$2 sm:$0xff]  ;;  %509 = vst [vmem:[#allocation2 + $0x19] sm:$0xff] %v476_v50  ;;  %510 = vst [vmem:[#allocation2 + $0x21] sm:$0xff] %v477_v51  ;;  %v543_v29 = vld [vmem:[#allocation2 + $0x30] ss:$2 sm:$0xff]  ;;  %v4896_v35 = vpack.c.bf16 %v837_v33, %v836_v32 }
  0xb5   : > { %v577_v48 = vld [vmem:[#allocation2 + $0x61] ss:$2 sm:$0xff]  ;;  %4021 = vmatmul.mubr.f32.vlgmr.msra.gmra.mrb[0].mxu0 %v575_v45  ;;  %513 = vst [vmem:[#allocation2 + $0x49] sm:$0xff] %v480_v52  ;;  %514 = vst [vmem:[#allocation2 + $0x51] sm:$0xff] %v481_v53  ;;  %v545_v31 = vld [vmem:[#allocation2 + $0x60] ss:$2 sm:$0xff] }
  0xb6   : > { %4859 = vmatpush3.bf16.msra.mxu0 %v4856_v42  ;;  %4023 = vmatprep.mubr.f32.mxu0 %v577_v48  ;;  %v579_v54 = vld [vmem:[#allocation2 + $0x91] ss:$2 sm:$0xff]  ;;  %517 = vst [vmem:[#allocation2 + $0x79] sm:$0xff] %v484_v59  ;;  %518 = vst [vmem:[#allocation2 + $0x81] sm:$0xff] %v485_v61  ;;  %v547_v34 = vld [vmem:[#allocation2 + $0x90] ss:$2 sm:$0xff] }
  0xb7   : > { %4861 = vmatprep.subr.bf16.mxu0 %v4860_v46  ;;  %v581_v56 = vld [vmem:[#allocation2 + $0xc1] ss:$2 sm:$0xff]  ;;  %521 = vst [vmem:[#allocation2 + $0xa9] sm:$0xff] %v488_v62  ;;  %522 = vst [vmem:[#allocation2 + $0xb1] sm:$0xff] %v489_v63  ;;  %v549_v36 = vld [vmem:[#allocation2 + $0xc0] ss:$2 sm:$0xff] }
  0xb8   : > { %v583_v60 = vld [vmem:[#allocation2 + $0xf1] ss:$2 sm:$0xff]  ;;  %525 = vst [vmem:[#allocation2 + $0xd9] sm:$0xff] %v492_v0  ;;  %526 = vst [vmem:[#allocation2 + $0xe1] sm:$0xff] %v493_v4  ;;  %v551_v39 = vld [vmem:[#allocation2 + $0xf0] ss:$2 sm:$0xff] }
  0xb9   : > { %4024 = vmatmul.mubr.f32.gmra.mrb[2].mxu0 %v579_v54  ;;  %v585_v3 = vld [vmem:[#allocation2 + $0x121] ss:$2 sm:$0xff]  ;;  %529 = vst [vmem:[#allocation2 + $0x109] sm:$0xff] %v496_v6  ;;  %530 = vst [vmem:[#allocation2 + $0x111] sm:$0xff] %v497_v7  ;;  %v553_v41 = vld [vmem:[#allocation2 + $0x120] ss:$2 sm:$0xff] }
  0xba   : > { %4863 = vmatpush3.bf16.msra.mxu0 %v4860_v46  ;;  %4026 = vmatprep.mubr.f32.mxu0 %v581_v56  ;;  %v587_v10 = vld [vmem:[#allocation2 + $0x151] ss:$2 sm:$0xff]  ;;  %533 = vst [vmem:[#allocation2 + $0x139] sm:$0xff] %v500_v8  ;;  %534 = vst [vmem:[#allocation2 + $0x141] sm:$0xff] %v501_v9  ;;  %v555_v44 = vld [vmem:[#allocation2 + $0x150] ss:$2 sm:$0xff] }
  0xbb   : > { %4865 = vmatprep.subr.bf16.mxu0 %v4864_v55  ;;  %537 = vst [vmem:[#allocation2 + $0x169] sm:$0xff] %v504_v11  ;;  %538 = vst [vmem:[#allocation2 + $0x171] sm:$0xff] %v505_v14  ;;  %v840_v42 = vld [vmem:[#allocation7 + $0x140] sm:$0xff]  ;;  %v843_v48 = vld [vmem:[#allocation7 + $0x158] sm:$0xff] }
  0xbc   : > { %v4904_v45 = vpack.c.bf16 %v841_v43, %v840_v42  ;;  %v816_v46 = vld [vmem:[#allocation2 + $0x2] ss:$2 sm:$0xff]  ;;  %v4908_v49 = vpack.c.bf16 %v843_v48, %v842_v47  ;;  %v845_v51 = vld [vmem:[#allocation7 + $0x168] sm:$0xff] }
  0xbd   : > { %4027 = vmatmul.mubr.f32.gmra.mrb[4].mxu0 %v583_v60  ;;  %v844_v50 = vld [vmem:[#allocation7 + $0x160] sm:$0xff]  ;;  %v846_v53 = vld [vmem:[#allocation7 + $0x170] sm:$0xff]  ;;  %v847_v54 = vld [vmem:[#allocation7 + $0x178] sm:$0xff] }
  0xbe   : > { %4867 = vmatpush3.bf16.msra.mxu0 %v4864_v55  ;;  %4029 = vmatprep.mubr.f32.mxu0 %v585_v3  ;;  %v4912_v52 = vpack.c.bf16 %v845_v51, %v844_v50  ;;  %v4916_v55 = vpack.c.bf16 %v847_v54, %v846_v53  ;;  %v977_v56 = vld [vmem:[#allocation7 + $0x180] sm:$0xff]  ;;  %v979_v59 = vld [vmem:[#allocation7 + $0x190] sm:$0xff]  ;;  %v980_v60 = vld [vmem:[#allocation7 + $0x198] sm:$0xff] }
  0xbf   : > { %4869 = vmatprep.subr.bf16.mxu0 %v4868_v1  ;;  %v4920_v58 = vpack.c.bf16 %v978_v57, %v977_v56  ;;  %v818_v61 = vld [vmem:[#allocation2 + $0x32] ss:$2 sm:$0xff]  ;;  %v4924_v62 = vpack.c.bf16 %v980_v60, %v979_v59  ;;  %v820_v63 = vld [vmem:[#allocation2 + $0x62] ss:$2 sm:$0xff]  ;;  %v1107_v48 = vld [vmem:[#allocation2 + $0x19] ss:$2 sm:$0xff] }
  0xc0   : > { %v981_v0 = vld [vmem:[#allocation7 + $0x1a0] sm:$0xff]  ;;  %v984_v6 = vld [vmem:[#allocation7 + $0x1b8] sm:$0xff]  ;;  %v986_v11 = vld [vmem:[#allocation7 + $0x1c8] sm:$0xff] }
  0xc1   : > { %4030 = vmatmul.mubr.f32.gmra.mrb[6].mxu0 %v587_v10  ;;  %v822_v2 = vld [vmem:[#allocation2 + $0x92] ss:$2 sm:$0xff]  ;;  %v824_v4 = vld [vmem:[#allocation2 + $0xc2] ss:$2 sm:$0xff]  ;;  %v4932_v8 = vpack.c.bf16 %v984_v6, %v983_v5  ;;  %v1115_v6 = vld [vmem:[#allocation2 + $0xd9] ss:$2 sm:$0xff] }
  0xc2   : > { %4871 = vmatpush3.bf16.msra.mxu0 %v4868_v1  ;;  %4064 = vmatprep.mubr.f32.mxu0 %v541_v13  ;;  %v982_v1 = vld [vmem:[#allocation7 + $0x1a8] sm:$0xff]  ;;  %v828_v9 = vld [vmem:[#allocation2 + $0x122] ss:$2 sm:$0xff] }
  0xc3   : > { %4873 = vmatprep.subr.bf16.mxu0 %v4872_v12  ;;  %v4928_v3 = vpack.c.bf16 %v982_v1, %v981_v0  ;;  %v826_v7 = vld [vmem:[#allocation2 + $0xf2] ss:$2 sm:$0xff]  ;;  %v992_v22 = vld [vmem:[#allocation7 + $0x1f8] sm:$0xff]  ;;  %v1111_v1 = vld [vmem:[#allocation2 + $0x79] ss:$2 sm:$0xff] }
  0xc4   : > { %v985_v10 = vld [vmem:[#allocation7 + $0x1c0] sm:$0xff]  ;;  %v961_v14 = vld [vmem:[#allocation2 + $0x18] ss:$2 sm:$0xff]  ;;  %v507_v24 = vld [vmem:[%s6123_s12 + $0xf8] sm:$0xff]  ;;  %v4948_v25 = vpack.c.bf16 %v992_v22, %v991_v21 }
  0xc5   : > { %v4936_v13 = vpack.c.bf16 %v986_v11, %v985_v10  ;;  %540 = vst [vmem:[#allocation2 + $0x189] sm:$0xff] %v507_v24  ;;  %v1124_v27 = vld [vmem:[#allocation7 + $0x208] sm:$0xff]  ;;  %v1134_v50 = vld [vmem:[#allocation7 + $0x258] sm:$0xff]  ;;  %v1938_v21 = vld [vmem:[#allocation9 + $0x90] sm:$0xff] }
  0xc6   : > { %4875 = vmatpush3.bf16.msra.mxu0 %v4872_v12  ;;  %v830_v12 = vld [vmem:[#allocation2 + $0x152] ss:$2 sm:$0xff]  ;;  %v1138_v56 = vld [vmem:[#allocation7 + $0x278] sm:$0xff]  ;;  %v1119_v11 = vld [vmem:[#allocation2 + $0x139] ss:$2 sm:$0xff] }
  0xc7   : > { %4877 = vmatprep.subr.bf16.mxu0 %v4876_v17  ;;  %v965_v33 = vld [vmem:[#allocation2 + $0x78] ss:$2 sm:$0xff] }
  0xc8   : > { %v969_v38 = vld [vmem:[#allocation2 + $0xd8] ss:$2 sm:$0xff] }
  0xc9   : > { %v973_v43 = vld [vmem:[#allocation2 + $0x138] ss:$2 sm:$0xff] }
  0xca   : > { %4879 = vmatpush3.bf16.msra.mxu0 %v4876_v17  ;;  %v4940_v17 = vpack.c.bf16 %v988_v16, %v987_v15  ;;  %v1136_v53 = vld [vmem:[#allocation7 + $0x268] sm:$0xff] }
  0xcb   : > { %4881 = vmatprep.subr.bf16.mxu0 %v4880_v20  ;;  %v1270_v59 = vld [vmem:[#allocation7 + $0x288] sm:$0xff] }
  0xcc   : > { %v1253_v16 = vld [vmem:[#allocation2 + $0x1a] ss:$2 sm:$0xff] }
  0xce   : > { %4883 = vmatpush3.bf16.msra.mxu0 %v4880_v20  ;;  %v4944_v20 = vpack.c.bf16 %v990_v19, %v989_v18  ;;  %v1280_v18 = vld [vmem:[#allocation7 + $0x2d8] sm:$0xff]  ;;  %v1936_v19 = vld [vmem:[#allocation9 + $0x80] sm:$0xff] }
  0xcf   : > { %4885 = vmatprep.subr.bf16.mxu0 %v4884_v23 }
  0xd2   : > { %4887 = vmatpush3.bf16.msra.mxu0 %v4884_v23  ;;  %v506_v23 = vld [vmem:[%s6123_s12 + $0xf0] sm:$0xff]  ;;  %s3518_s12 = sshll.u32 %s6119_s10, 6 }
  0xd3   : > { %4889 = vmatprep.subr.bf16.mxu0 %v4888_v26  ;;  %539 = vst [vmem:[#allocation2 + $0x181] sm:$0xff] %v506_v23  ;;  %v1939_v23 = vld [vmem:[#allocation9 + $0x98] sm:$0xff]  ;;  %s6434_s19 = scalar_lea.vmem [#allocation12], %s3518_s12 }
  0xd4   : > { %s3356_s30 = sshll.u32 %s6434_s19, 4  ;;  %s6449_s30 = int_to_ptr.vmem [resolvable:$true] %s3356_s30 }
  0xd5   : > { %4065 = vmatmul.mubr.f32.vlgmr.msra.gmra.mrb[0].mxu0 %v543_v29  ;;  %v1125_v29 = vld [vmem:[#allocation7 + $0x210] sm:$0xff]  ;;  %s5773_s24 = scalar_lea.vmem %s6449_s30, 1024  ;;  %p5780_p12 = scmp.lt.s32.totalorder %s6449_s30, %s5778_s28 }
  0xd6   : > { %4891 = vmatpush3.bf16.msra.mxu0 %v4888_v26  ;;  %4067 = vmatprep.mubr.f32.mxu0 %v545_v31  ;;  %v1123_v26 = vld [vmem:[#allocation7 + $0x200] sm:$0xff]  ;;  %p5774_p10 = scmp.ne.s32.totalorder %s6449_s30, %s5773_s24  ;;  %p5781_p1 = scmp.lt.s32.totalorder %s5779_s27, %s5773_s24 }
  0xd7   : > { %4893 = vmatprep.subr.bf16.mxu0 %v4892_v30  ;;  %v4952_v28 = vpack.c.bf16 %v1124_v27, %v1123_v26  ;;  %v963_v31 = vld [vmem:[#allocation2 + $0x48] ss:$2 sm:$0xff]  ;;  %v1941_v27 = vld [vmem:[#allocation9 + $0xa8] sm:$0xff] }
  0xd8   : > { %v1940_v26 = vld [vmem:[#allocation9 + $0xa0] sm:$0xff]  ;;  %p5775_p3 = pnand %p5774_p10, %p6068_p5  ;;  %p5782_p2 = por %p5781_p1, %p5780_p12 }
  0xd9   : > { %4068 = vmatmul.mubr.f32.gmra.mrb[2].mxu0 %v547_v34  ;;  %v1127_v34 = vld [vmem:[#allocation7 + $0x220] sm:$0xff] }
  0xda   : > { %4895 = vmatpush3.bf16.msra.mxu0 %v4892_v30  ;;  %4070 = vmatprep.mubr.f32.mxu0 %v549_v36  ;;  %v1126_v30 = vld [vmem:[#allocation7 + $0x218] sm:$0xff]  ;;  %p5776_p7 = pneg %p5775_p3 }
  0xdb   : > { %4897 = vmatprep.subr.bf16.mxu0 %v4896_v35  ;;  %v4956_v32 = vpack.c.bf16 %v1126_v30, %v1125_v29  ;;  %v967_v36 = vld [vmem:[#allocation2 + $0xa8] ss:$2 sm:$0xff]  ;;  %v1282_v29 = vld [vmem:[#allocation7 + $0x2e8] sm:$0xff]  ;;  %v5120_v30 = vpack.c.bf16 %v1941_v27, %v1940_v26 }
  0xdc   : > { %v1411_v26 = vld [vmem:[#allocation2 + $0x150] ss:$2 sm:$0xff]  ;;  %p5783_p4 = pnand %p5782_p2, %p5776_p7 }
  0xdd   : > { %4071 = vmatmul.mubr.f32.gmra.mrb[4].mxu0 %v551_v39  ;;  %v1129_v39 = vld [vmem:[#allocation7 + $0x230] sm:$0xff]  ;;  %v1569_v27 = vld [vmem:[#allocation7 + $0x3c0] sm:$0xff] }
  0xde   : > { %4899 = vmatpush3.bf16.msra.mxu0 %v4896_v35  ;;  %4073 = vmatprep.mubr.f32.mxu0 %v553_v41  ;;  %v1128_v35 = vld [vmem:[#allocation7 + $0x228] sm:$0xff]  ;;  %v971_v41 = vld [vmem:[#allocation2 + $0x108] ss:$2 sm:$0xff] }
  0xdf   : > { %4901 = vmatprep.subr.bf16.mxu0 %v4900_v40  ;;  %v4960_v37 = vpack.c.bf16 %v1128_v35, %v1127_v34  ;;  %v1283_v34 = vld [vmem:[#allocation7 + $0x2f0] sm:$0xff]  ;;  %v1284_v35 = vld [vmem:[#allocation7 + $0x2f8] sm:$0xff] }
  0xe1   : > { %4074 = vmatmul.mubr.f32.gmra.mrb[6].mxu0 %v555_v44  ;;  %v1131_v44 = vld [vmem:[#allocation7 + $0x240] sm:$0xff] }
  0xe2   : > { %4903 = vmatpush3.bf16.msra.mxu0 %v4900_v40  ;;  %4108 = vmatprep.mubr.f32.mxu0 %v816_v46  ;;  %v1130_v40 = vld [vmem:[#allocation7 + $0x238] sm:$0xff] }
  0xe3   : > { %4905 = vmatprep.subr.bf16.mxu0 %v4904_v45  ;;  %v4964_v42 = vpack.c.bf16 %v1130_v40, %v1129_v39  ;;  %v975_v46 = vld [vmem:[#allocation2 + $0x168] ss:$2 sm:$0xff]  ;;  %v1945_v39 = vld [vmem:[#allocation9 + $0xc8] sm:$0xff] }
  0xe4   : > { %v1415_v40 = vld [vmem:[#allocation7 + $0x300] sm:$0xff] }
  0xe6   : > { %4907 = vmatpush3.bf16.msra.mxu0 %v4904_v45  ;;  %v1132_v45 = vld [vmem:[#allocation7 + $0x248] sm:$0xff] }
  0xe7   : > { %4909 = vmatprep.subr.bf16.mxu0 %v4908_v49  ;;  %v4968_v47 = vpack.c.bf16 %v1132_v45, %v1131_v44  ;;  %v1417_v44 = vld [vmem:[#allocation7 + $0x310] sm:$0xff]  ;;  %v1418_v45 = vld [vmem:[#allocation7 + $0x318] sm:$0xff] }
  0xea   : > { %4911 = vmatpush3.bf16.msra.mxu0 %v4908_v49  ;;  %v1133_v49 = vld [vmem:[#allocation7 + $0x250] sm:$0xff] }
  0xeb   : > { %4913 = vmatprep.subr.bf16.mxu0 %v4912_v52  ;;  %v4972_v51 = vpack.c.bf16 %v1134_v50, %v1133_v49  ;;  %v1419_v49 = vld [vmem:[#allocation7 + $0x320] sm:$0xff]  ;;  %v1420_v50 = vld [vmem:[#allocation7 + $0x328] sm:$0xff] }
  0xee   : > { %4915 = vmatpush3.bf16.msra.mxu0 %v4912_v52  ;;  %v1135_v52 = vld [vmem:[#allocation7 + $0x260] sm:$0xff] }
  0xef   : > { %4917 = vmatprep.subr.bf16.mxu0 %v4916_v55  ;;  %v4976_v54 = vpack.c.bf16 %v1136_v53, %v1135_v52  ;;  %v5024_v52 = vpack.c.bf16 %v1420_v50, %v1419_v49  ;;  %v1261_v53 = vld [vmem:[#allocation2 + $0xda] ss:$2 sm:$0xff]  ;;  %v1711_v49 = vld [vmem:[#allocation7 + $0x420] sm:$0xff] }
  0xf0   : > { %v1712_v50 = vld [vmem:[#allocation7 + $0x428] sm:$0xff] }
  0xf2   : > { %4919 = vmatpush3.bf16.msra.mxu0 %v4916_v55  ;;  %v1137_v55 = vld [vmem:[#allocation7 + $0x270] sm:$0xff] }
  0xf3   : > { %4921 = vmatprep.subr.bf16.mxu0 %v4920_v58  ;;  %v4980_v57 = vpack.c.bf16 %v1138_v56, %v1137_v55  ;;  %v1422_v55 = vld [vmem:[#allocation7 + $0x338] sm:$0xff] }
  0xf4   : > { %v1263_v56 = vld [vmem:[#allocation2 + $0x10a] ss:$2 sm:$0xff] }
  0xf5   : > { %4109 = vmatmul.mubr.f32.vlgmr.msra.gmra.mrb[0].mxu0 %v818_v61  ;;  %v1271_v61 = vld [vmem:[#allocation7 + $0x290] sm:$0xff] }
  0xf6   : > { %4923 = vmatpush3.bf16.msra.mxu0 %v4920_v58  ;;  %4111 = vmatprep.mubr.f32.mxu0 %v820_v63  ;;  %v1269_v58 = vld [vmem:[#allocation7 + $0x280] sm:$0xff] }
  0xf7   : > { %4925 = vmatprep.subr.bf16.mxu0 %v4924_v62  ;;  %v4984_v60 = vpack.c.bf16 %v1270_v59, %v1269_v58  ;;  %v1109_v63 = vld [vmem:[#allocation2 + $0x49] ss:$2 sm:$0xff]  ;;  %v1265_v58 = vld [vmem:[#allocation2 + $0x13a] ss:$2 sm:$0xff] }
  0xf8   : > { %v1423_v59 = vld [vmem:[#allocation7 + $0x340] sm:$0xff] }
  0xf9   : > { %4112 = vmatmul.mubr.f32.gmra.mrb[2].mxu0 %v822_v2  ;;  %v1273_v2 = vld [vmem:[#allocation7 + $0x2a0] sm:$0xff] }
  0xfa   : > { %4927 = vmatpush3.bf16.msra.mxu0 %v4924_v62  ;;  %4114 = vmatprep.mubr.f32.mxu0 %v824_v4  ;;  %v1272_v62 = vld [vmem:[#allocation7 + $0x298] sm:$0xff] }
  0xfb   : > { %4929 = vmatprep.subr.bf16.mxu0 %v4928_v3  ;;  %v4988_v0 = vpack.c.bf16 %v1272_v62, %v1271_v61  ;;  %v1113_v4 = vld [vmem:[#allocation2 + $0xa9] ss:$2 sm:$0xff]  ;;  %v1267_v61 = vld [vmem:[#allocation2 + $0x16a] ss:$2 sm:$0xff] }
  0xfd   : > { %4115 = vmatmul.mubr.f32.gmra.mrb[4].mxu0 %v826_v7  ;;  %v1275_v7 = vld [vmem:[#allocation7 + $0x2b0] sm:$0xff] }
  0xfe   : > { %4931 = vmatpush3.bf16.msra.mxu0 %v4928_v3  ;;  %4117 = vmatprep.mubr.f32.mxu0 %v828_v9  ;;  %v1274_v3 = vld [vmem:[#allocation7 + $0x2a8] sm:$0xff]  ;;  %v1117_v9 = vld [vmem:[#allocation2 + $0x109] ss:$2 sm:$0xff] }
  0xff   : > { %4933 = vmatprep.subr.bf16.mxu0 %v4932_v8  ;;  %v4992_v5 = vpack.c.bf16 %v1274_v3, %v1273_v2  ;;  %v1427_v3 = vld [vmem:[#allocation7 + $0x360] sm:$0xff] }
 0x101   : > { %4118 = vmatmul.mubr.f32.gmra.mrb[6].mxu0 %v830_v12  ;;  %v1277_v12 = vld [vmem:[#allocation7 + $0x2c0] sm:$0xff] }
 0x102   : > { %4935 = vmatpush3.bf16.msra.mxu0 %v4932_v8  ;;  %4152 = vmatprep.mubr.f32.mxu0 %v961_v14  ;;  %v1276_v8 = vld [vmem:[#allocation7 + $0x2b8] sm:$0xff] }
 0x103   : > { %4937 = vmatprep.subr.bf16.mxu0 %v4936_v13  ;;  %v4996_v10 = vpack.c.bf16 %v1276_v8, %v1275_v7  ;;  %v1121_v14 = vld [vmem:[#allocation2 + $0x169] ss:$2 sm:$0xff] }
 0x104   : > { %v1430_v7 = vld [vmem:[#allocation7 + $0x378] sm:$0xff] }
 0x106   : > { %4939 = vmatpush3.bf16.msra.mxu0 %v4936_v13  ;;  %v1278_v13 = vld [vmem:[#allocation7 + $0x2c8] sm:$0xff] }
 0x107   : > { %4941 = vmatprep.subr.bf16.mxu0 %v4940_v17  ;;  %v5000_v15 = vpack.c.bf16 %v1278_v13, %v1277_v12  ;;  %v1563_v12 = vld [vmem:[#allocation7 + $0x390] sm:$0xff]  ;;  %v1564_v13 = vld [vmem:[#allocation7 + $0x398] sm:$0xff] }
 0x10a   : > { %4943 = vmatpush3.bf16.msra.mxu0 %v4940_v17  ;;  %v1279_v17 = vld [vmem:[#allocation7 + $0x2d0] sm:$0xff] }
 0x10b   : > { %4945 = vmatprep.subr.bf16.mxu0 %v4944_v20  ;;  %v5004_v24 = vpack.c.bf16 %v1280_v18, %v1279_v17  ;;  %v1565_v17 = vld [vmem:[#allocation7 + $0x3a0] sm:$0xff]  ;;  %v1566_v18 = vld [vmem:[#allocation7 + $0x3a8] sm:$0xff] }
 0x10e   : > { %4947 = vmatpush3.bf16.msra.mxu0 %v4944_v20  ;;  %v1937_v20 = vld [vmem:[#allocation9 + $0x88] sm:$0xff] }
 0x10f   : > { %4949 = vmatprep.subr.bf16.mxu0 %v4948_v25  ;;  %v5112_v22 = vpack.c.bf16 %v1937_v20, %v1936_v19  ;;  %v1405_v19 = vld [vmem:[#allocation2 + $0xc0] ss:$2 sm:$0xff]  ;;  %v5056_v20 = vpack.c.bf16 %v1566_v18, %v1565_v17 }
 0x110   : > { %v1947_v17 = vld [vmem:[#allocation9 + $0xd8] sm:$0xff] }
 0x111   : > { %5113 = vmatprep.subr.bf16.mxu1 %v5112_v22 }
 0x112   : > { %4951 = vmatpush3.bf16.msra.mxu0 %v4948_v25  ;;  %v5116_v25 = vpack.c.bf16 %v1939_v23, %v1938_v21  ;;  %5115 = vmatpush3.bf16.msra.mxu1 %v5112_v22  ;;  %v1407_v21 = vld [vmem:[#allocation2 + $0xf0] ss:$2 sm:$0xff]  ;;  %v1567_v22 = vld [vmem:[#allocation7 + $0x3b0] sm:$0xff]  ;;  %v1568_v23 = vld [vmem:[#allocation7 + $0x3b8] sm:$0xff] }
 0x113   : > { %4953 = vmatprep.subr.bf16.mxu0 %v4952_v28 }
 0x114   : > { %5117 = vmatprep.subr.bf16.mxu1 %v5116_v25 }
 0x115   : > { %4153 = vmatmul.mubr.f32.vlgmr.msra.gmra.mrb[0].mxu0 %v963_v31 }
 0x116   : > { %4955 = vmatpush3.bf16.msra.mxu0 %v4952_v28  ;;  %4155 = vmatprep.mubr.f32.mxu0 %v965_v33  ;;  %v1281_v28 = vld [vmem:[#allocation7 + $0x2e0] sm:$0xff]  ;;  %v1943_v33 = vld [vmem:[#allocation9 + $0xb8] sm:$0xff] }
 0x117   : > { %4957 = vmatprep.subr.bf16.mxu0 %v4956_v32  ;;  %v5008_v31 = vpack.c.bf16 %v1282_v29, %v1281_v28  ;;  %5119 = vmatpush3.bf16.msra.mxu1 %v5116_v25  ;;  %v5060_v25 = vpack.c.bf16 %v1568_v23, %v1567_v22  ;;  %v1570_v28 = vld [vmem:[#allocation7 + $0x3c8] sm:$0xff]  ;;  %v1413_v29 = vld [vmem:[#allocation2 + $0x180] ss:$2 sm:$0xff] }
 0x118   : > { %5121 = vmatprep.subr.bf16.mxu1 %v5120_v30  ;;  %v1950_v22 = vld [vmem:[#allocation9 + $0xf0] sm:$0xff]  ;;  %v1951_v23 = vld [vmem:[#allocation9 + $0xf8] sm:$0xff] }
 0x119   : > { %4156 = vmatmul.mubr.f32.gmra.mrb[2].mxu0 %v967_v36 }
 0x11a   : > { %4959 = vmatpush3.bf16.msra.mxu0 %v4956_v32  ;;  %4158 = vmatprep.mubr.f32.mxu0 %v969_v38  ;;  %v1942_v32 = vld [vmem:[#allocation9 + $0xb0] sm:$0xff]  ;;  %v1944_v38 = vld [vmem:[#allocation9 + $0xc0] sm:$0xff] }
 0x11b   : > { %4961 = vmatprep.subr.bf16.mxu0 %v4960_v37  ;;  %v5124_v36 = vpack.c.bf16 %v1943_v33, %v1942_v32  ;;  %5123 = vmatpush3.bf16.msra.mxu1 %v5120_v30  ;;  %v5064_v30 = vpack.c.bf16 %v1570_v28, %v1569_v27  ;;  %v1571_v32 = vld [vmem:[#allocation7 + $0x3d0] sm:$0xff]  ;;  %v1572_v33 = vld [vmem:[#allocation7 + $0x3d8] sm:$0xff]  ;;  %v1927_v28 = vld [vmem:[#allocation3 + $0x1] sm:$0xff] }
 0x11c   : > { %4416 = vmatprep.mubr.f32.mxu1 %v1927_v28  ;;  %v2175_v28 = vld [vmem:[#allocation9 + $0x120] sm:$0xff] }
 0x11d   : > { %4159 = vmatmul.mubr.f32.gmra.mrb[4].mxu0 %v971_v41  ;;  %v1416_v41 = vld [vmem:[#allocation7 + $0x308] sm:$0xff]  ;;  %5125 = vmatprep.subr.bf16.mxu1 %v5124_v36 }
 0x11e   : > { %4963 = vmatpush3.bf16.msra.mxu0 %v4960_v37  ;;  %4161 = vmatprep.mubr.f32.mxu0 %v973_v43  ;;  %v5012_v37 = vpack.c.bf16 %v1284_v35, %v1283_v34  ;;  %v5016_v43 = vpack.c.bf16 %v1416_v41, %v1415_v40  ;;  %v5068_v34 = vpack.c.bf16 %v1572_v33, %v1571_v32  ;;  %v1573_v35 = vld [vmem:[#allocation7 + $0x3e0] sm:$0xff] }
 0x11f   : > { %4965 = vmatprep.subr.bf16.mxu0 %v4964_v42  ;;  %5127 = vmatpush3.bf16.msra.mxu1 %v5124_v36  ;;  %v1574_v36 = vld [vmem:[#allocation7 + $0x3e8] sm:$0xff]  ;;  %v1707_v41 = vld [vmem:[#allocation7 + $0x400] sm:$0xff] }
 0x121   : > { %4162 = vmatmul.mubr.f32.gmra.mrb[6].mxu0 %v975_v46  ;;  %v1255_v46 = vld [vmem:[#allocation2 + $0x4a] ss:$2 sm:$0xff] }
 0x122   : > { %4967 = vmatpush3.bf16.msra.mxu0 %v4964_v42  ;;  %4196 = vmatprep.mubr.f32.mxu0 %v1107_v48  ;;  %v5128_v42 = vpack.c.bf16 %v1945_v39, %v1944_v38  ;;  %v1257_v48 = vld [vmem:[#allocation2 + $0x7a] ss:$2 sm:$0xff] }
 0x123   : > { %4969 = vmatprep.subr.bf16.mxu0 %v4968_v47  ;;  %v1575_v38 = vld [vmem:[#allocation7 + $0x3f0] sm:$0xff]  ;;  %v1576_v39 = vld [vmem:[#allocation7 + $0x3f8] sm:$0xff] }
 0x124   : > { %5129 = vmatprep.subr.bf16.mxu1 %v5128_v42  ;;  %v5076_v40 = vpack.c.bf16 %v1576_v39, %v1575_v38 }
 0x125   : > { %5131 = vmatpush3.bf16.msra.mxu1 %v5128_v42  ;;  %v1708_v42 = vld [vmem:[#allocation7 + $0x408] sm:$0xff] }
 0x126   : > { %4971 = vmatpush3.bf16.msra.mxu0 %v4968_v47  ;;  %v5020_v47 = vpack.c.bf16 %v1418_v45, %v1417_v44  ;;  %v1709_v44 = vld [vmem:[#allocation7 + $0x410] sm:$0xff]  ;;  %v1710_v45 = vld [vmem:[#allocation7 + $0x418] sm:$0xff] }
 0x127   : > { %4973 = vmatprep.subr.bf16.mxu0 %v4972_v51 }
 0x12a   : > { %4975 = vmatpush3.bf16.msra.mxu0 %v4972_v51  ;;  %v1259_v51 = vld [vmem:[#allocation2 + $0xaa] ss:$2 sm:$0xff] }
 0x12b   : > { %4977 = vmatprep.subr.bf16.mxu0 %v4976_v54 }
 0x12e   : > { %4979 = vmatpush3.bf16.msra.mxu0 %v4976_v54  ;;  %v1421_v54 = vld [vmem:[#allocation7 + $0x330] sm:$0xff] }
 0x12f   : > { %4981 = vmatprep.subr.bf16.mxu0 %v4980_v57 }
 0x132   : > { %4983 = vmatpush3.bf16.msra.mxu0 %v4980_v57  ;;  %v5028_v57 = vpack.c.bf16 %v1422_v55, %v1421_v54  ;;  %v1713_v54 = vld [vmem:[#allocation7 + $0x430] sm:$0xff]  ;;  %v1714_v55 = vld [vmem:[#allocation7 + $0x438] sm:$0xff] }
 0x133   : > { %4985 = vmatprep.subr.bf16.mxu0 %v4984_v60 }
 0x135   : > { %4197 = vmatmul.mubr.f32.vlgmr.msra.gmra.mrb[0].mxu0 %v1109_v63  ;;  %v1399_v63 = vld [vmem:[#allocation2 + $0x30] ss:$2 sm:$0xff] }
 0x136   : > { %4987 = vmatpush3.bf16.msra.mxu0 %v4984_v60  ;;  %4199 = vmatprep.mubr.f32.mxu0 %v1111_v1  ;;  %v1424_v60 = vld [vmem:[#allocation7 + $0x348] sm:$0xff]  ;;  %v1426_v1 = vld [vmem:[#allocation7 + $0x358] sm:$0xff] }
 0x137   : > { %4989 = vmatprep.subr.bf16.mxu0 %v4988_v0  ;;  %v5032_v62 = vpack.c.bf16 %v1424_v60, %v1423_v59  ;;  %v1715_v59 = vld [vmem:[#allocation7 + $0x440] sm:$0xff]  ;;  %v1716_v60 = vld [vmem:[#allocation7 + $0x448] sm:$0xff] }
 0x139   : > { %4200 = vmatmul.mubr.f32.gmra.mrb[2].mxu0 %v1113_v4  ;;  %v1428_v4 = vld [vmem:[#allocation7 + $0x368] sm:$0xff] }
 0x13a   : > { %4991 = vmatpush3.bf16.msra.mxu0 %v4988_v0  ;;  %4202 = vmatprep.mubr.f32.mxu0 %v1115_v6  ;;  %v1425_v0 = vld [vmem:[#allocation7 + $0x350] sm:$0xff] }
 0x13b   : > { %4993 = vmatprep.subr.bf16.mxu0 %v4992_v5  ;;  %v5036_v2 = vpack.c.bf16 %v1426_v1, %v1425_v0  ;;  %v1429_v6 = vld [vmem:[#allocation7 + $0x370] sm:$0xff]  ;;  %v1718_v1 = vld [vmem:[#allocation7 + $0x458] sm:$0xff] }
 0x13c   : > { %v5044_v8 = vpack.c.bf16 %v1430_v7, %v1429_v6  ;;  %v1717_v0 = vld [vmem:[#allocation7 + $0x450] sm:$0xff]  ;;  %v1722_v7 = vld [vmem:[#allocation7 + $0x478] sm:$0xff] }
 0x13d   : > { %4203 = vmatmul.mubr.f32.gmra.mrb[4].mxu0 %v1117_v9  ;;  %v1561_v9 = vld [vmem:[#allocation7 + $0x380] sm:$0xff]  ;;  %v1721_v6 = vld [vmem:[#allocation7 + $0x470] sm:$0xff] }
 0x13e   : > { %4995 = vmatpush3.bf16.msra.mxu0 %v4992_v5  ;;  %4205 = vmatprep.mubr.f32.mxu0 %v1119_v11  ;;  %v5040_v5 = vpack.c.bf16 %v1428_v4, %v1427_v3  ;;  %v1719_v3 = vld [vmem:[#allocation7 + $0x460] sm:$0xff]  ;;  %v1720_v4 = vld [vmem:[#allocation7 + $0x468] sm:$0xff] }
 0x13f   : > { %4997 = vmatprep.subr.bf16.mxu0 %v4996_v10 }
 0x141   : > { %4206 = vmatmul.mubr.f32.gmra.mrb[6].mxu0 %v1121_v14  ;;  %v1401_v14 = vld [vmem:[#allocation2 + $0x60] ss:$2 sm:$0xff] }
 0x142   : > { %4999 = vmatpush3.bf16.msra.mxu0 %v4996_v10  ;;  %4240 = vmatprep.mubr.f32.mxu0 %v1253_v16  ;;  %v1562_v10 = vld [vmem:[#allocation7 + $0x388] sm:$0xff] }
 0x143   : > { %5001 = vmatprep.subr.bf16.mxu0 %v5000_v15  ;;  %v5048_v11 = vpack.c.bf16 %v1562_v10, %v1561_v9  ;;  %v1403_v16 = vld [vmem:[#allocation2 + $0x90] ss:$2 sm:$0xff] }
 0x144   : > { %v1693_v9 = vld [vmem:[#allocation2 + $0x62] ss:$2 sm:$0xff]  ;;  %v1695_v10 = vld [vmem:[#allocation2 + $0x92] ss:$2 sm:$0xff] }
 0x146   : > { %5003 = vmatpush3.bf16.msra.mxu0 %v5000_v15  ;;  %v5052_v15 = vpack.c.bf16 %v1564_v13, %v1563_v12  ;;  %v1699_v12 = vld [vmem:[#allocation2 + $0xf2] ss:$2 sm:$0xff]  ;;  %v1701_v13 = vld [vmem:[#allocation2 + $0x122] ss:$2 sm:$0xff] }
 0x147   : > { %5005 = vmatprep.subr.bf16.mxu0 %v5004_v24 }
 0x14a   : > { %5007 = vmatpush3.bf16.msra.mxu0 %v5004_v24  ;;  %v1409_v24 = vld [vmem:[#allocation2 + $0x120] ss:$2 sm:$0xff] }
 0x14b   : > { %5009 = vmatprep.subr.bf16.mxu0 %v5008_v31 }
 0x14e   : > { %5011 = vmatpush3.bf16.msra.mxu0 %v5008_v31  ;;  %v1545_v31 = vld [vmem:[#allocation2 + $0x31] ss:$2 sm:$0xff] }
 0x14f   : > { %5013 = vmatprep.subr.bf16.mxu0 %v5012_v37 }
 0x152   : > { %5015 = vmatpush3.bf16.msra.mxu0 %v5012_v37  ;;  %v5072_v37 = vpack.c.bf16 %v1574_v36, %v1573_v35  ;;  %v1913_v36 = vld [vmem:[#allocation9 + $0x10] sm:$0xff] }
 0x153   : > { %5017 = vmatprep.subr.bf16.mxu0 %v5016_v43 }
 0x155   : > { %4241 = vmatmul.mubr.f32.vlgmr.msra.gmra.mrb[0].mxu0 %v1255_v46  ;;  %v1547_v46 = vld [vmem:[#allocation2 + $0x61] ss:$2 sm:$0xff] }
 0x156   : > { %5019 = vmatpush3.bf16.msra.mxu0 %v5016_v43  ;;  %4243 = vmatprep.mubr.f32.mxu0 %v1257_v48  ;;  %v5080_v43 = vpack.c.bf16 %v1708_v42, %v1707_v41  ;;  %v1549_v48 = vld [vmem:[#allocation2 + $0x91] ss:$2 sm:$0xff] }
 0x157   : > { %5021 = vmatprep.subr.bf16.mxu0 %v5020_v47 }
 0x159   : > { %4244 = vmatmul.mubr.f32.gmra.mrb[2].mxu0 %v1259_v51  ;;  %v1551_v51 = vld [vmem:[#allocation2 + $0xc1] ss:$2 sm:$0xff] }
 0x15a   : > { %5023 = vmatpush3.bf16.msra.mxu0 %v5020_v47  ;;  %4246 = vmatprep.mubr.f32.mxu0 %v1261_v53  ;;  %v5084_v47 = vpack.c.bf16 %v1710_v45, %v1709_v44  ;;  %v1553_v53 = vld [vmem:[#allocation2 + $0xf1] ss:$2 sm:$0xff] }
 0x15b   : > { %5025 = vmatprep.subr.bf16.mxu0 %v5024_v52 }
 0x15d   : > { %4247 = vmatmul.mubr.f32.gmra.mrb[4].mxu0 %v1263_v56  ;;  %v1555_v56 = vld [vmem:[#allocation2 + $0x121] ss:$2 sm:$0xff] }
 0x15e   : > { %5027 = vmatpush3.bf16.msra.mxu0 %v5024_v52  ;;  %4249 = vmatprep.mubr.f32.mxu0 %v1265_v58  ;;  %v5088_v52 = vpack.c.bf16 %v1712_v50, %v1711_v49  ;;  %v1557_v58 = vld [vmem:[#allocation2 + $0x151] ss:$2 sm:$0xff] }
 0x15f   : > { %5029 = vmatprep.subr.bf16.mxu0 %v5028_v57 }
 0x161   : > { %4250 = vmatmul.mubr.f32.gmra.mrb[6].mxu0 %v1267_v61  ;;  %v1559_v61 = vld [vmem:[#allocation2 + $0x181] ss:$2 sm:$0xff] }
 0x162   : > { %5031 = vmatpush3.bf16.msra.mxu0 %v5028_v57  ;;  %4284 = vmatprep.mubr.f32.mxu0 %v1399_v63  ;;  %v5092_v57 = vpack.c.bf16 %v1714_v55, %v1713_v54  ;;  %v1691_v63 = vld [vmem:[#allocation2 + $0x32] ss:$2 sm:$0xff] }
 0x163   : > { %5033 = vmatprep.subr.bf16.mxu0 %v5032_v62 }
 0x166   : > { %5035 = vmatpush3.bf16.msra.mxu0 %v5032_v62  ;;  %v5096_v62 = vpack.c.bf16 %v1716_v60, %v1715_v59  ;;  %v1918_v59 = vld [vmem:[#allocation9 + $0x38] sm:$0xff] }
 0x167   : > { %5037 = vmatprep.subr.bf16.mxu0 %v5036_v2 }
 0x16a   : > { %5039 = vmatpush3.bf16.msra.mxu0 %v5036_v2  ;;  %v5100_v2 = vpack.c.bf16 %v1718_v1, %v1717_v0 }
 0x16b   : > { %5041 = vmatprep.subr.bf16.mxu0 %v5040_v5 }
 0x16e   : > { %5043 = vmatpush3.bf16.msra.mxu0 %v5040_v5  ;;  %v5104_v5 = vpack.c.bf16 %v1720_v4, %v1719_v3 }
 0x16f   : > { %5045 = vmatprep.subr.bf16.mxu0 %v5044_v8 }
 0x172   : > { %5047 = vmatpush3.bf16.msra.mxu0 %v5044_v8  ;;  %v5108_v8 = vpack.c.bf16 %v1722_v7, %v1721_v6  ;;  %v1920_v6 = vld [vmem:[#allocation9 + $0x48] sm:$0xff] }
 0x173   : > { %5049 = vmatprep.subr.bf16.mxu0 %v5048_v11 }
 0x175   : > { %4285 = vmatmul.mubr.f32.vlgmr.msra.gmra.mrb[0].mxu0 %v1401_v14  ;;  %v1703_v14 = vld [vmem:[#allocation2 + $0x152] ss:$2 sm:$0xff] }
 0x176   : > { %5051 = vmatpush3.bf16.msra.mxu0 %v5048_v11  ;;  %4287 = vmatprep.mubr.f32.mxu0 %v1403_v16  ;;  %v1697_v11 = vld [vmem:[#allocation2 + $0xc2] ss:$2 sm:$0xff] }
 0x177   : > { %5053 = vmatprep.subr.bf16.mxu0 %v5052_v15  ;;  %v1946_v16 = vld [vmem:[#allocation9 + $0xd0] sm:$0xff] }
 0x178   : > { %v5132_v18 = vpack.c.bf16 %v1947_v17, %v1946_v16  ;;  %v1924_v16 = vld [vmem:[#allocation9 + $0x68] sm:$0xff] }
 0x179   : > { %4288 = vmatmul.mubr.f32.gmra.mrb[2].mxu0 %v1405_v19  ;;  %v1948_v19 = vld [vmem:[#allocation9 + $0xe0] sm:$0xff] }
 0x17a   : > { %5055 = vmatpush3.bf16.msra.mxu0 %v5052_v15  ;;  %4290 = vmatprep.mubr.f32.mxu0 %v1407_v21  ;;  %v1705_v15 = vld [vmem:[#allocation2 + $0x182] ss:$2 sm:$0xff] }
 0x17b   : > { %5057 = vmatprep.subr.bf16.mxu0 %v5056_v20  ;;  %5133 = vmatprep.subr.bf16.mxu1 %v5132_v18 }
 0x17c   : > { %5135 = vmatpush3.bf16.msra.mxu1 %v5132_v18  ;;  %v1925_v18 = vld [vmem:[#allocation9 + $0x70] sm:$0xff] }
 0x17d   : > { %4291 = vmatmul.mubr.f32.gmra.mrb[4].mxu0 %v1409_v24  ;;  %v5140_v24 = vpack.c.bf16 %v1951_v23, %v1950_v22  ;;  %v2172_v22 = vld [vmem:[#allocation9 + $0x108] sm:$0xff] }
 0x17e   : > { %5059 = vmatpush3.bf16.msra.mxu0 %v5056_v20  ;;  %4293 = vmatprep.mubr.f32.mxu0 %v1411_v26  ;;  %v1949_v20 = vld [vmem:[#allocation9 + $0xe8] sm:$0xff] }
 0x17f   : > { %5061 = vmatprep.subr.bf16.mxu0 %v5060_v25  ;;  %v5136_v21 = vpack.c.bf16 %v1949_v20, %v1948_v19  ;;  %v1912_v26 = vld [vmem:[#allocation9 + $0x8] sm:$0xff]  ;;  %v1926_v19 = vld [vmem:[#allocation9 + $0x78] sm:$0xff] }
 0x180   : > { %v5172_v20 = vpack.c.bf16 %v1926_v19, %v1925_v18 }
 0x181   : > { %4294 = vmatmul.mubr.f32.gmra.mrb[6].mxu0 %v1413_v29  ;;  %5137 = vmatprep.subr.bf16.mxu1 %v5136_v21  ;;  %v3519_v29 = vld [vmem:[%s6497_s2] ss:$0 sm:$0xff] }
 0x182   : > { %5063 = vmatpush3.bf16.msra.mxu0 %v5060_v25  ;;  %4328 = vmatprep.mubr.f32.mxu0 %v1545_v31  ;;  %v1911_v25 = vld [vmem:[#allocation9] sm:$0xff]  ;;  %v3520_v31 = vld [vmem:[%s6498_s3] ss:$0 sm:$0xff] }
 0x183   : > { %5065 = vmatprep.subr.bf16.mxu0 %v5064_v30  ;;  %5139 = vmatpush3.bf16.msra.mxu1 %v5136_v21  ;;  %v5144_v27 = vpack.c.bf16 %v1912_v26, %v1911_v25  ;;  %v2171_v21 = vld [vmem:[#allocation9 + $0x100] sm:$0xff]  ;;  %v2174_v25 = vld [vmem:[#allocation9 + $0x118] sm:$0xff] }
 0x184   : > { %5141 = vmatprep.subr.bf16.mxu1 %v5140_v24  ;;  %v5176_v23 = vpack.c.bf16 %v2172_v22, %v2171_v21  ;;  %v2320_v21 = vld [vmem:[#allocation9 + $0x1d8] sm:$0xff] }
 0x186   : > { %5067 = vmatpush3.bf16.msra.mxu0 %v5064_v30 }
 0x187   : > { %5069 = vmatprep.subr.bf16.mxu0 %v5068_v34  ;;  %5143 = vmatpush3.bf16.msra.mxu1 %v5140_v24  ;;  %v2173_v24 = vld [vmem:[#allocation9 + $0x110] sm:$0xff] }
 0x188   : > { %5145 = vmatprep.subr.bf16.mxu1 %v5144_v27  ;;  %v5180_v26 = vpack.c.bf16 %v2174_v25, %v2173_v24  ;;  %v2322_v24 = vld [vmem:[#allocation9 + $0x1e8] sm:$0xff] }
 0x18a   : > { %5071 = vmatpush3.bf16.msra.mxu0 %v5068_v34 }
 0x18b   : > { %5073 = vmatprep.subr.bf16.mxu0 %v5072_v37 }
 0x18e   : > { %5075 = vmatpush3.bf16.msra.mxu0 %v5072_v37  ;;  %v1914_v37 = vld [vmem:[#allocation9 + $0x18] sm:$0xff] }
 0x18f   : > { %5077 = vmatprep.subr.bf16.mxu0 %v5076_v40  ;;  %v5148_v45 = vpack.c.bf16 %v1914_v37, %v1913_v36 }
 0x192   : > { %5079 = vmatpush3.bf16.msra.mxu0 %v5076_v40 }
 0x193   : > { %5081 = vmatprep.subr.bf16.mxu0 %v5080_v43 }
 0x195   : > { %4329 = vmatmul.mubr.f32.vlgmr.msra.gmra.mrb[0].mxu0 %v1547_v46 }
 0x196   : > { %5083 = vmatpush3.bf16.msra.mxu0 %v5080_v43  ;;  %4331 = vmatprep.mubr.f32.mxu0 %v1549_v48  ;;  %v1916_v48 = vld [vmem:[#allocation9 + $0x28] sm:$0xff] }
 0x197   : > { %5085 = vmatprep.subr.bf16.mxu0 %v5084_v47 }
 0x199   : > { %4332 = vmatmul.mubr.f32.gmra.mrb[2].mxu0 %v1551_v51 }
 0x19a   : > { %5087 = vmatpush3.bf16.msra.mxu0 %v5084_v47  ;;  %4334 = vmatprep.mubr.f32.mxu0 %v1553_v53  ;;  %v1915_v47 = vld [vmem:[#allocation9 + $0x20] sm:$0xff] }
 0x19b   : > { %5089 = vmatprep.subr.bf16.mxu0 %v5088_v52 }
 0x19d   : > { %4335 = vmatmul.mubr.f32.gmra.mrb[4].mxu0 %v1555_v56  ;;  %v5152_v56 = vpack.c.bf16 %v1916_v48, %v1915_v47  ;;  %v2182_v47 = vld [vmem:[#allocation9 + $0x158] sm:$0xff] }
 0x19e   : > { %5091 = vmatpush3.bf16.msra.mxu0 %v5088_v52  ;;  %4337 = vmatprep.mubr.f32.mxu0 %v1557_v58  ;;  %v1917_v58 = vld [vmem:[#allocation9 + $0x30] sm:$0xff] }
 0x19f   : > { %5093 = vmatprep.subr.bf16.mxu0 %v5092_v57  ;;  %v5156_v3 = vpack.c.bf16 %v1918_v59, %v1917_v58  ;;  %v2310_v58 = vld [vmem:[#allocation9 + $0x188] sm:$0xff] }
 0x1a1   : > { %4338 = vmatmul.mubr.f32.gmra.mrb[6].mxu0 %v1559_v61 }
 0x1a2   : > { %5095 = vmatpush3.bf16.msra.mxu0 %v5092_v57  ;;  %4372 = vmatprep.mubr.f32.mxu0 %v1691_v63 }
 0x1a3   : > { %5097 = vmatprep.subr.bf16.mxu0 %v5096_v62 }
 0x1a6   : > { %5099 = vmatpush3.bf16.msra.mxu0 %v5096_v62 }
 0x1a7   : > { %5101 = vmatprep.subr.bf16.mxu0 %v5100_v2 }
 0x1aa   : > { %5103 = vmatpush3.bf16.msra.mxu0 %v5100_v2 }
 0x1ab   : > { %5105 = vmatprep.subr.bf16.mxu0 %v5104_v5 }
 0x1ae   : > { %5107 = vmatpush3.bf16.msra.mxu0 %v5104_v5  ;;  %v1919_v5 = vld [vmem:[#allocation9 + $0x40] sm:$0xff] }
 0x1af   : > { %5109 = vmatprep.subr.bf16.mxu0 %v5108_v8 }
 0x1b2   : > { %5111 = vmatpush3.bf16.msra.mxu0 %v5108_v8 }
 0x1b5   : > { %4373 = vmatmul.mubr.f32.vlgmr.msra.gmra.mrb[0].mxu0 %v1693_v9 }
 0x1b6   : > { %4375 = vmatprep.mubr.f32.mxu0 %v1695_v10  ;;  %v5160_v10 = vpack.c.bf16 %v1920_v6, %v1919_v5 }
 0x1b9   : > { %4376 = vmatmul.mubr.f32.gmra.mrb[2].mxu0 %v1697_v11  ;;  %v1921_v11 = vld [vmem:[#allocation9 + $0x50] sm:$0xff] }
 0x1ba   : > { %4378 = vmatprep.mubr.f32.mxu0 %v1699_v12  ;;  %v1922_v12 = vld [vmem:[#allocation9 + $0x58] sm:$0xff] }
 0x1bd   : > { %4379 = vmatmul.mubr.f32.gmra.mrb[4].mxu0 %v1701_v13  ;;  %v6278_v13 = vld [vmem:[#allocation2 + $0x198] sm:$0xff] }
 0x1be   : > { %4381 = vmatprep.mubr.f32.mxu0 %v1703_v14  ;;  %v5164_v14 = vpack.c.bf16 %v1922_v12, %v1921_v11 }
 0x1c1   : > { %4382 = vmatmul.mubr.f32.gmra.mrb[6].mxu0 %v1705_v15  ;;  %v1923_v15 = vld [vmem:[#allocation9 + $0x60] sm:$0xff] }
 0x1c2   : > { %v5168_v17 = vpack.c.bf16 %v1924_v16, %v1923_v15  ;;  %v2317_v15 = vld [vmem:[#allocation9 + $0x1c0] sm:$0xff]  ;;  %v2318_v16 = vld [vmem:[#allocation9 + $0x1c8] sm:$0xff] }
 0x1c3   : > { %v5224_v18 = vpack.c.bf16 %v2318_v16, %v2317_v15  ;;  %v3175_v15 = vld [vmem:[#allocation10 + $0x40] sm:$0xff] }
 0x288   : > { %v4374_v30 = vpop.f32.mrb[0].mxu0 }
 0x289   : > { %v1844_v32 = vmul.f32 %v4374_v30, %v3519_v29  ;;  %v1789_v33 = vpop.f32.mrb[1].mxu0 }
 0x28a   : > { %v1843_v34 = vmul.f32 %v3519_v29, %v1789_v33  ;;  %v2177_v33 = vld [vmem:[#allocation9 + $0x130] sm:$0xff] }
 0x28b   : > { %v1859_v35 = vadd.f32 %v3520_v31, %v1844_v32 }
 0x28c   : > { %v1858_v38 = vadd.f32 %v3520_v31, %v1843_v34  ;;  %v4377_v39 = vpop.f32.mrb[2].mxu0  ;;  %v2178_v34 = vld [vmem:[#allocation9 + $0x138] sm:$0xff] }
 0x28d   : > { %v6247_v40 = vmax.f32 %v1859_v35, 0.0  ;;  %v1846_v41 = vmul.f32 %v4377_v39, %v3519_v29  ;;  %v1799_v42 = vpop.f32.mrb[3].mxu0  ;;  %v5188_v36 = vpack.c.bf16 %v2178_v34, %v2177_v33  ;;  %v2180_v39 = vld [vmem:[#allocation9 + $0x148] sm:$0xff] }
 0x28e   : > { %v6249_v43 = vmax.f32 %v1858_v38, 0.0  ;;  %v1845_v44 = vmul.f32 %v3519_v29, %v1799_v42  ;;  %v2179_v38 = vld [vmem:[#allocation9 + $0x140] sm:$0xff]  ;;  %v2448_v33 = vld [vmem:[#allocation9 + $0x208] sm:$0xff] }
 0x28f   : > { %1896 = vst [vmem:[#allocation3 + $0x21] sm:$0xff] %v6247_v40  ;;  %v1861_v46 = vadd.f32 %v3520_v31, %v1846_v41  ;;  %v5192_v42 = vpack.c.bf16 %v2180_v39, %v2179_v38  ;;  %v2450_v38 = vld [vmem:[#allocation9 + $0x218] sm:$0xff] }
 0x290   : > { %1895 = vst [vmem:[#allocation3 + $0x11] sm:$0xff] %v6249_v43  ;;  %v1860_v49 = vadd.f32 %v3520_v31, %v1845_v44  ;;  %v4380_v50 = vpop.f32.mrb[4].mxu0  ;;  %4417 = vmatmul.mubr.f32.vlgmr.msra.gmra.mrb[0].mxu1 %v6249_v43  ;;  %v2162_v44 = vld [vmem:[#allocation3 + $0x2] sm:$0xff] }
 0x291   : > { %v6254_v51 = vmax.f32 %v1861_v46, 0.0  ;;  %v1848_v52 = vmul.f32 %v4380_v50, %v3519_v29  ;;  %v1809_v53 = vpop.f32.mrb[5].mxu0  ;;  %5147 = vmatpush3.bf16.msra.mxu1 %v5144_v27  ;;  %4419 = vmatprep.mubr.f32.mxu1 %v6247_v40  ;;  %v2181_v46 = vld [vmem:[#allocation9 + $0x150] sm:$0xff]  ;;  %v2184_v50 = vld [vmem:[#allocation9 + $0x168] sm:$0xff] }
 0x292   : > { %v6257_v54 = vmax.f32 %v1860_v49, 0.0  ;;  %v1847_v55 = vmul.f32 %v3519_v29, %v1809_v53  ;;  %5149 = vmatprep.subr.bf16.mxu1 %v5148_v45  ;;  %v5196_v48 = vpack.c.bf16 %v2182_v47, %v2181_v46  ;;  %v2183_v49 = vld [vmem:[#allocation9 + $0x160] sm:$0xff]  ;;  %v2185_v53 = vld [vmem:[#allocation9 + $0x170] sm:$0xff]  ;;  %v2452_v46 = vld [vmem:[#allocation9 + $0x228] sm:$0xff] }
 0x293   : > { %1898 = vst [vmem:[#allocation3 + $0x41] sm:$0xff] %v6254_v51  ;;  %v1863_v57 = vadd.f32 %v3520_v31, %v1848_v52  ;;  %v5200_v52 = vpack.c.bf16 %v2184_v50, %v2183_v49  ;;  %v3170_v50 = vld [vmem:[#allocation10 + $0x18] sm:$0xff] }
 0x294   : > { %1897 = vst [vmem:[#allocation3 + $0x31] sm:$0xff] %v6257_v54  ;;  %v1862_v60 = vadd.f32 %v3520_v31, %v1847_v55  ;;  %v4383_v61 = vpop.f32.mrb[6].mxu0  ;;  %4420 = vmatmul.mubr.f32.gmra.mrb[2].mxu1 %v6257_v54  ;;  %v2186_v55 = vld [vmem:[#allocation9 + $0x178] sm:$0xff] }
 0x295   : > { %v6262_v62 = vmax.f32 %v1863_v57, 0.0  ;;  %v1850_v63 = vmul.f32 %v4383_v61, %v3519_v29  ;;  %v1819_v0 = vpop.f32.mrb[7].mxu0  ;;  %5151 = vmatpush3.bf16.msra.mxu1 %v5148_v45  ;;  %4422 = vmatprep.mubr.f32.mxu1 %v6254_v51  ;;  %v2309_v57 = vld [vmem:[#allocation9 + $0x180] sm:$0xff]  ;;  %v2312_v61 = vld [vmem:[#allocation9 + $0x198] sm:$0xff] }
 0x296   : > { %v6265_v1 = vmax.f32 %v1862_v60, 0.0  ;;  %v1849_v2 = vmul.f32 %v3519_v29, %v1819_v0  ;;  %5153 = vmatprep.subr.bf16.mxu1 %v5152_v56  ;;  %v2176_v29 = vld [vmem:[#allocation9 + $0x128] sm:$0xff]  ;;  %v6284_v30 = vld [vmem:[#allocation3 + $0x20] sm:$0xff]  ;;  %v5208_v59 = vpack.c.bf16 %v2310_v58, %v2309_v57  ;;  %v2311_v60 = vld [vmem:[#allocation9 + $0x190] sm:$0xff] }
 0x297   : > { %1900 = vst [vmem:[#allocation3 + $0x61] sm:$0xff] %v6262_v62  ;;  %v1865_v4 = vadd.f32 %v3520_v31, %v1850_v63  ;;  %v6281_v27 = vld [vmem:[#allocation3 + $0x10] sm:$0xff]  ;;  %v5212_v63 = vpack.c.bf16 %v2312_v61, %v2311_v60  ;;  %v3172_v58 = vld [vmem:[#allocation10 + $0x28] sm:$0xff] }
 0x298   : > { %1899 = vst [vmem:[#allocation3 + $0x51] sm:$0xff] %v6265_v1  ;;  %v1864_v7 = vadd.f32 %v3520_v31, %v1849_v2  ;;  %4423 = vmatmul.mubr.f32.gmra.mrb[4].mxu1 %v6265_v1  ;;  %v5184_v31 = vpack.c.bf16 %v2176_v29, %v2175_v28  ;;  %v6302_v0 = vld [vmem:[#allocation3 + $0x12] sm:$0xff]  ;;  %v2313_v2 = vld [vmem:[#allocation9 + $0x1a0] sm:$0xff]  ;;  %v2456_v60 = vld [vmem:[#allocation9 + $0x248] sm:$0xff] }
 0x299   : > { %v6270_v8 = vmax.f32 %v1865_v4, 0.0  ;;  %5155 = vmatpush3.bf16.msra.mxu1 %v5152_v56  ;;  %4425 = vmatprep.mubr.f32.mxu1 %v6262_v62  ;;  %v5204_v56 = vpack.c.bf16 %v2186_v55, %v2185_v53  ;;  %v6305_v4 = vld [vmem:[#allocation3 + $0x22] sm:$0xff]  ;;  %v2324_v28 = vld [vmem:[#allocation9 + $0x1f8] sm:$0xff] }
 0x29a   : > { %v6273_v9 = vmax.f32 %v1864_v7, 0.0  ;;  %5157 = vmatprep.subr.bf16.mxu1 %v5156_v3  ;;  %v6290_v35 = vld [vmem:[#allocation3 + $0x40] sm:$0xff]  ;;  %v2315_v7 = vld [vmem:[#allocation9 + $0x1b0] sm:$0xff]  ;;  %v2454_v53 = vld [vmem:[#allocation9 + $0x238] sm:$0xff] }
 0x29b   : > { %1902 = vst [vmem:[#allocation3 + $0x81] sm:$0xff] %v6270_v8  ;;  %v6287_v32 = vld [vmem:[#allocation3 + $0x30] sm:$0xff]  ;;  %v6311_v11 = vld [vmem:[#allocation3 + $0x42] sm:$0xff] }
 0x29c   : > { %1901 = vst [vmem:[#allocation3 + $0x71] sm:$0xff] %v6273_v9  ;;  %4426 = vmatmul.mubr.f32.gmra.mrb[6].mxu1 %v6273_v9  ;;  %v6308_v6 = vld [vmem:[#allocation3 + $0x32] sm:$0xff] }
 0x29d   : > { %5159 = vmatpush3.bf16.msra.mxu1 %v5156_v3  ;;  %4460 = vmatprep.mubr.f32.mxu1 %v6278_v13  ;;  %v2314_v3 = vld [vmem:[#allocation9 + $0x1a8] sm:$0xff] }
 0x29e   : > { %5161 = vmatprep.subr.bf16.mxu1 %v5160_v10  ;;  %v6296_v41 = vld [vmem:[#allocation3 + $0x60] sm:$0xff]  ;;  %v5216_v5 = vpack.c.bf16 %v2314_v3, %v2313_v2  ;;  %v3173_v2 = vld [vmem:[#allocation10 + $0x30] sm:$0xff]  ;;  %v3174_v3 = vld [vmem:[#allocation10 + $0x38] sm:$0xff] }
 0x29f   : > { %v6293_v37 = vld [vmem:[#allocation3 + $0x50] sm:$0xff] }
 0x2a1   : > { %5163 = vmatpush3.bf16.msra.mxu1 %v5160_v10  ;;  %v2316_v10 = vld [vmem:[#allocation9 + $0x1b8] sm:$0xff] }
 0x2a2   : > { %5165 = vmatprep.subr.bf16.mxu1 %v5164_v14  ;;  %v5220_v12 = vpack.c.bf16 %v2316_v10, %v2315_v7  ;;  %v2457_v7 = vld [vmem:[#allocation9 + $0x250] sm:$0xff]  ;;  %v2458_v10 = vld [vmem:[#allocation9 + $0x258] sm:$0xff] }
 0x2a3   : > { %v6299_v45 = vld [vmem:[#allocation3 + $0x70] sm:$0xff]  ;;  %v5260_v16 = vpack.c.bf16 %v2458_v10, %v2457_v7  ;;  %v2594_v7 = vld [vmem:[#allocation9 + $0x2c8] sm:$0xff] }
 0x2a4   : > { %v6320_v19 = vld [vmem:[#allocation3 + $0x72] sm:$0xff] }
 0x2a5   : > { %5167 = vmatpush3.bf16.msra.mxu1 %v5164_v14  ;;  %v6314_v14 = vld [vmem:[#allocation3 + $0x52] sm:$0xff] }
 0x2a6   : > { %5169 = vmatprep.subr.bf16.mxu1 %v5168_v17 }
 0x2a9   : > { %5171 = vmatpush3.bf16.msra.mxu1 %v5168_v17  ;;  %v6317_v17 = vld [vmem:[#allocation3 + $0x62] sm:$0xff] }
 0x2aa   : > { %5173 = vmatprep.subr.bf16.mxu1 %v5172_v20 }
 0x2ad   : > { %5175 = vmatpush3.bf16.msra.mxu1 %v5172_v20  ;;  %v2319_v20 = vld [vmem:[#allocation9 + $0x1d0] sm:$0xff] }
 0x2ae   : > { %5177 = vmatprep.subr.bf16.mxu1 %v5176_v23  ;;  %v5228_v22 = vpack.c.bf16 %v2320_v21, %v2319_v20  ;;  %v2459_v20 = vld [vmem:[#allocation9 + $0x260] sm:$0xff]  ;;  %v2460_v21 = vld [vmem:[#allocation9 + $0x268] sm:$0xff] }
 0x2b0   : > { %4461 = vmatmul.mubr.f32.vlgmr.msra.gmra.mrb[0].mxu1 %v6281_v27 }
 0x2b1   : > { %4463 = vmatprep.mubr.f32.mxu1 %v6284_v30  ;;  %5179 = vmatpush3.bf16.msra.mxu1 %v5176_v23  ;;  %v2321_v23 = vld [vmem:[#allocation9 + $0x1e0] sm:$0xff] }
 0x2b2   : > { %5181 = vmatprep.subr.bf16.mxu1 %v5180_v26  ;;  %v5232_v25 = vpack.c.bf16 %v2322_v24, %v2321_v23  ;;  %v3177_v23 = vld [vmem:[#allocation10 + $0x50] sm:$0xff]  ;;  %v5264_v24 = vpack.c.bf16 %v2460_v21, %v2459_v20  ;;  %v2597_v20 = vld [vmem:[#allocation9 + $0x2e0] sm:$0xff]  ;;  %v2598_v21 = vld [vmem:[#allocation9 + $0x2e8] sm:$0xff] }
 0x2b4   : > { %4464 = vmatmul.mubr.f32.gmra.mrb[2].mxu1 %v6287_v32 }
 0x2b5   : > { %4466 = vmatprep.mubr.f32.mxu1 %v6290_v35  ;;  %5183 = vmatpush3.bf16.msra.mxu1 %v5180_v26  ;;  %v2323_v26 = vld [vmem:[#allocation9 + $0x1f0] sm:$0xff] }
 0x2b6   : > { %5185 = vmatprep.subr.bf16.mxu1 %v5184_v31  ;;  %v5236_v29 = vpack.c.bf16 %v2324_v28, %v2323_v26  ;;  %v2462_v26 = vld [vmem:[#allocation9 + $0x278] sm:$0xff] }
 0x2b8   : > { %4467 = vmatmul.mubr.f32.gmra.mrb[4].mxu1 %v6293_v37 }
 0x2b9   : > { %4469 = vmatprep.mubr.f32.mxu1 %v6296_v41  ;;  %5187 = vmatpush3.bf16.msra.mxu1 %v5184_v31  ;;  %v2447_v31 = vld [vmem:[#allocation9 + $0x200] sm:$0xff] }
 0x2ba   : > { %5189 = vmatprep.subr.bf16.mxu1 %v5188_v36  ;;  %v5240_v34 = vpack.c.bf16 %v2448_v33, %v2447_v31  ;;  %v3180_v33 = vld [vmem:[#allocation10 + $0x68] sm:$0xff] }
 0x2bc   : > { %4470 = vmatmul.mubr.f32.gmra.mrb[6].mxu1 %v6299_v45 }
 0x2bd   : > { %5191 = vmatpush3.bf16.msra.mxu1 %v5188_v36  ;;  %4504 = vmatprep.mubr.f32.mxu1 %v2162_v44  ;;  %v2449_v36 = vld [vmem:[#allocation9 + $0x210] sm:$0xff]  ;;  %v2451_v44 = vld [vmem:[#allocation9 + $0x220] sm:$0xff] }
 0x2be   : > { %5193 = vmatprep.subr.bf16.mxu1 %v5192_v42  ;;  %v5244_v39 = vpack.c.bf16 %v2450_v38, %v2449_v36  ;;  %v5248_v49 = vpack.c.bf16 %v2452_v46, %v2451_v44  ;;  %v2586_v36 = vld [vmem:[#allocation9 + $0x288] sm:$0xff]  ;;  %v2587_v44 = vld [vmem:[#allocation9 + $0x290] sm:$0xff]  ;;  %v2588_v46 = vld [vmem:[#allocation9 + $0x298] sm:$0xff] }
 0x2c1   : > { %5195 = vmatpush3.bf16.msra.mxu1 %v5192_v42  ;;  %v3168_v42 = vld [vmem:[#allocation10 + $0x8] sm:$0xff] }
 0x2c2   : > { %5197 = vmatprep.subr.bf16.mxu1 %v5196_v48 }
 0x2c5   : > { %5199 = vmatpush3.bf16.msra.mxu1 %v5196_v48  ;;  %v3169_v48 = vld [vmem:[#allocation10 + $0x10] sm:$0xff] }
 0x2c6   : > { %5201 = vmatprep.subr.bf16.mxu1 %v5200_v52  ;;  %v6330_v55 = vpack.c.bf16 %v3170_v50, %v3169_v48  ;;  %v5276_v50 = vpack.c.bf16 %v2588_v46, %v2587_v44  ;;  %v2731_v44 = vld [vmem:[#allocation9 + $0x338] sm:$0xff] }
 0x2c9   : > { %5203 = vmatpush3.bf16.msra.mxu1 %v5200_v52  ;;  %v2453_v52 = vld [vmem:[#allocation9 + $0x230] sm:$0xff] }
 0x2ca   : > { %5205 = vmatprep.subr.bf16.mxu1 %v5204_v56  ;;  %v5252_v57 = vpack.c.bf16 %v2454_v53, %v2453_v52  ;;  %v2589_v52 = vld [vmem:[#allocation9 + $0x2a0] sm:$0xff]  ;;  %v2590_v53 = vld [vmem:[#allocation9 + $0x2a8] sm:$0xff] }
 0x2cd   : > { %5207 = vmatpush3.bf16.msra.mxu1 %v5204_v56  ;;  %v3171_v56 = vld [vmem:[#allocation10 + $0x20] sm:$0xff] }
 0x2ce   : > { %5209 = vmatprep.subr.bf16.mxu1 %v5208_v59  ;;  %v6336_v61 = vpack.c.bf16 %v3172_v58, %v3171_v56  ;;  %v3160_v56 = vld [vmem:[#allocation2 + $0x49] ss:$2 sm:$0xff]  ;;  %v5280_v58 = vpack.c.bf16 %v2590_v53, %v2589_v52 }
 0x2cf   : > { %v6380_v53 = vld [vmem:[#allocation3 + $0x82] sm:$0xff] }
 0x2d0   : > { %4505 = vmatmul.mubr.f32.vlgmr.msra.gmra.mrb[0].mxu1 %v6302_v0 }
 0x2d1   : > { %4507 = vmatprep.mubr.f32.mxu1 %v6305_v4  ;;  %5211 = vmatpush3.bf16.msra.mxu1 %v5208_v59  ;;  %v2455_v59 = vld [vmem:[#allocation9 + $0x240] sm:$0xff] }
 0x2d2   : > { %5213 = vmatprep.subr.bf16.mxu1 %v5212_v63 }
 0x2d4   : > { %4508 = vmatmul.mubr.f32.gmra.mrb[2].mxu1 %v6308_v6 }
 0x2d5   : > { %4510 = vmatprep.mubr.f32.mxu1 %v6311_v11  ;;  %5215 = vmatpush3.bf16.msra.mxu1 %v5212_v63  ;;  %v5256_v63 = vpack.c.bf16 %v2456_v60, %v2455_v59  ;;  %v2591_v59 = vld [vmem:[#allocation9 + $0x2b0] sm:$0xff]  ;;  %v2592_v60 = vld [vmem:[#allocation9 + $0x2b8] sm:$0xff] }
 0x2d6   : > { %5217 = vmatprep.subr.bf16.mxu1 %v5216_v5 }
 0x2d8   : > { %4511 = vmatmul.mubr.f32.gmra.mrb[4].mxu1 %v6314_v14 }
 0x2d9   : > { %4513 = vmatprep.mubr.f32.mxu1 %v6317_v17  ;;  %5219 = vmatpush3.bf16.msra.mxu1 %v5216_v5  ;;  %v6341_v5 = vld [vmem:[#allocation3 + $0x80] sm:$0xff] }
 0x2da   : > { %5221 = vmatprep.subr.bf16.mxu1 %v5220_v12 }
 0x2dc   : > { %4514 = vmatmul.mubr.f32.gmra.mrb[6].mxu1 %v6320_v19 }
 0x2dd   : > { %5223 = vmatpush3.bf16.msra.mxu1 %v5220_v12  ;;  %4548 = vmatprep.mubr.f32.mxu1 %v6281_v27  ;;  %v3167_v27 = vld [vmem:[#allocation10] sm:$0xff]  ;;  %v6344_v12 = vpack.c.bf16 %v3174_v3, %v3173_v2  ;;  %v5284_v2 = vpack.c.bf16 %v2592_v60, %v2591_v59  ;;  %v2737_v60 = vld [vmem:[#allocation9 + $0x368] sm:$0xff] }
 0x2de   : > { %5225 = vmatprep.subr.bf16.mxu1 %v5224_v18  ;;  %v6324_v47 = vpack.c.bf16 %v3168_v42, %v3167_v27  ;;  %v3181_v27 = vld [vmem:[#allocation10 + $0x70] sm:$0xff]  ;;  %v3182_v42 = vld [vmem:[#allocation10 + $0x78] sm:$0xff]  ;;  %v2593_v3 = vld [vmem:[#allocation9 + $0x2c0] sm:$0xff] }
 0x2df   : > { %v6362_v48 = vpack.c.bf16 %v3182_v42, %v3181_v27  ;;  %v5288_v10 = vpack.c.bf16 %v2594_v7, %v2593_v3  ;;  %v2729_v27 = vld [vmem:[#allocation9 + $0x328] sm:$0xff]  ;;  %v2730_v42 = vld [vmem:[#allocation9 + $0x330] sm:$0xff]  ;;  %v2736_v59 = vld [vmem:[#allocation9 + $0x360] sm:$0xff] }
 0x2e0   : > { %5401 = vmatprep.subr.bf16.mxu0 %v6324_v47  ;;  %v5316_v46 = vpack.c.bf16 %v2731_v44, %v2730_v42  ;;  %v2739_v3 = vld [vmem:[#allocation9 + $0x378] sm:$0xff]  ;;  %v3002_v42 = vld [vmem:[#allocation9 + $0x410] sm:$0xff] }
 0x2e1   : > { %5227 = vmatpush3.bf16.msra.mxu1 %v5224_v18  ;;  %5403 = vmatpush3.bf16.msra.mxu0 %v6324_v47  ;;  %v3176_v18 = vld [vmem:[#allocation10 + $0x48] sm:$0xff]  ;;  %v3003_v44 = vld [vmem:[#allocation9 + $0x418] sm:$0xff] }
 0x2e2   : > { %5229 = vmatprep.subr.bf16.mxu1 %v5228_v22  ;;  %5405 = vmatprep.subr.bf16.mxu0 %v6330_v55 }
 0x2e5   : > { %5231 = vmatpush3.bf16.msra.mxu1 %v5228_v22  ;;  %5407 = vmatpush3.bf16.msra.mxu0 %v6330_v55  ;;  %v6350_v22 = vpack.c.bf16 %v3176_v18, %v3175_v15  ;;  %v2595_v15 = vld [vmem:[#allocation9 + $0x2d0] sm:$0xff] }
 0x2e6   : > { %5233 = vmatprep.subr.bf16.mxu1 %v5232_v25  ;;  %5409 = vmatprep.subr.bf16.mxu0 %v6336_v61 }
 0x2e9   : > { %5235 = vmatpush3.bf16.msra.mxu1 %v5232_v25  ;;  %5411 = vmatpush3.bf16.msra.mxu0 %v6336_v61  ;;  %v3178_v25 = vld [vmem:[#allocation10 + $0x58] sm:$0xff] }
 0x2ea   : > { %5237 = vmatprep.subr.bf16.mxu1 %v5236_v29  ;;  %5413 = vmatprep.subr.bf16.mxu0 %v6344_v12  ;;  %v6354_v28 = vpack.c.bf16 %v3178_v25, %v3177_v23  ;;  %v5296_v23 = vpack.c.bf16 %v2598_v21, %v2597_v20  ;;  %v2600_v25 = vld [vmem:[#allocation9 + $0x2f8] sm:$0xff]  ;;  %v2866_v21 = vld [vmem:[#allocation9 + $0x3a0] sm:$0xff] }
 0x2eb   : > { %v2865_v20 = vld [vmem:[#allocation9 + $0x398] sm:$0xff] }
 0x2ed   : > { %5239 = vmatpush3.bf16.msra.mxu1 %v5236_v29  ;;  %5415 = vmatpush3.bf16.msra.mxu0 %v6344_v12  ;;  %v3179_v29 = vld [vmem:[#allocation10 + $0x60] sm:$0xff] }
 0x2ee   : > { %5241 = vmatprep.subr.bf16.mxu1 %v5240_v34  ;;  %5417 = vmatprep.subr.bf16.mxu0 %v6350_v22  ;;  %v6358_v38 = vpack.c.bf16 %v3180_v33, %v3179_v29  ;;  %v2725_v29 = vld [vmem:[#allocation9 + $0x308] sm:$0xff]  ;;  %v2726_v33 = vld [vmem:[#allocation9 + $0x310] sm:$0xff] }
 0x2f0   : > { %4549 = vmatmul.mubr.f32.vlgmr.msra.gmra.mrb[0].mxu1 %v6284_v30 }
 0x2f1   : > { %4551 = vmatprep.mubr.f32.mxu1 %v6287_v32  ;;  %5243 = vmatpush3.bf16.msra.mxu1 %v5240_v34  ;;  %v2585_v34 = vld [vmem:[#allocation9 + $0x280] sm:$0xff] }
 0x2f2   : > { %5245 = vmatprep.subr.bf16.mxu1 %v5244_v39  ;;  %5419 = vmatpush3.bf16.msra.mxu0 %v6350_v22 }
 0x2f3   : > { %5421 = vmatprep.subr.bf16.mxu0 %v6354_v28 }
 0x2f4   : > { %4552 = vmatmul.mubr.f32.gmra.mrb[2].mxu1 %v6290_v35 }
 0x2f5   : > { %4554 = vmatprep.mubr.f32.mxu1 %v6293_v37  ;;  %5247 = vmatpush3.bf16.msra.mxu1 %v5244_v39  ;;  %v5272_v39 = vpack.c.bf16 %v2586_v36, %v2585_v34  ;;  %v2727_v34 = vld [vmem:[#allocation9 + $0x318] sm:$0xff]  ;;  %v2728_v36 = vld [vmem:[#allocation9 + $0x320] sm:$0xff] }
 0x2f6   : > { %5249 = vmatprep.subr.bf16.mxu1 %v5248_v49  ;;  %5423 = vmatpush3.bf16.msra.mxu0 %v6354_v28 }
 0x2f7   : > { %5425 = vmatprep.subr.bf16.mxu0 %v6358_v38 }
 0x2f8   : > { %4555 = vmatmul.mubr.f32.gmra.mrb[4].mxu1 %v6296_v41 }
 0x2f9   : > { %4557 = vmatprep.mubr.f32.mxu1 %v6299_v45  ;;  %5251 = vmatpush3.bf16.msra.mxu1 %v5248_v49  ;;  %v3159_v49 = vld [vmem:[#allocation2 + $0x19] ss:$2 sm:$0xff] }
 0x2fa   : > { %5253 = vmatprep.subr.bf16.mxu1 %v5252_v57  ;;  %5427 = vmatpush3.bf16.msra.mxu0 %v6358_v38 }
 0x2fb   : > { %5429 = vmatprep.subr.bf16.mxu0 %v6362_v48  ;;  %4812 = vmatprep.mubr.f32.mxu0 %v3159_v49  ;;  %v2732_v49 = vld [vmem:[#allocation9 + $0x340] sm:$0xff] }
 0x2fc   : > { %4558 = vmatmul.mubr.f32.gmra.mrb[6].mxu1 %v6341_v5 }
 0x2fd   : > { %5255 = vmatpush3.bf16.msra.mxu1 %v5252_v57  ;;  %4592 = vmatprep.mubr.f32.mxu1 %v6249_v43  ;;  %v2461_v43 = vld [vmem:[#allocation9 + $0x270] sm:$0xff] }
 0x2fe   : > { %5257 = vmatprep.subr.bf16.mxu1 %v5256_v63  ;;  %v5268_v31 = vpack.c.bf16 %v2462_v26, %v2461_v43  ;;  %5431 = vmatpush3.bf16.msra.mxu0 %v6362_v48  ;;  %v3161_v57 = vld [vmem:[#allocation2 + $0x79] ss:$2 sm:$0xff]  ;;  %v2724_v26 = vld [vmem:[#allocation9 + $0x300] sm:$0xff] }
 0x301   : > { %5259 = vmatpush3.bf16.msra.mxu1 %v5256_v63  ;;  %4813 = vmatmul.mubr.f32.vlgmr.msra.gmra.mrb[8].mxu0 %v3160_v56  ;;  %v3162_v63 = vld [vmem:[#allocation2 + $0xa9] ss:$2 sm:$0xff]  ;;  %v2734_v56 = vld [vmem:[#allocation9 + $0x350] sm:$0xff] }
 0x302   : > { %5261 = vmatprep.subr.bf16.mxu1 %v5260_v16  ;;  %4815 = vmatprep.mubr.f32.mxu0 %v3161_v57  ;;  %v2735_v57 = vld [vmem:[#allocation9 + $0x358] sm:$0xff] }
 0x305   : > { %5263 = vmatpush3.bf16.msra.mxu1 %v5260_v16  ;;  %4816 = vmatmul.mubr.f32.gmra.mrb[10].mxu0 %v3162_v63  ;;  %v2596_v16 = vld [vmem:[#allocation9 + $0x2d8] sm:$0xff]  ;;  %v5328_v63 = vpack.c.bf16 %v2737_v60, %v2736_v59  ;;  %v3009_v59 = vld [vmem:[#allocation9 + $0x448] sm:$0xff]  ;;  %v3010_v60 = vld [vmem:[#allocation9 + $0x450] sm:$0xff] }
 0x306   : > { %5265 = vmatprep.subr.bf16.mxu1 %v5264_v24  ;;  %v5292_v18 = vpack.c.bf16 %v2596_v16, %v2595_v15  ;;  %v2863_v15 = vld [vmem:[#allocation9 + $0x388] sm:$0xff] }
 0x309   : > { %5267 = vmatpush3.bf16.msra.mxu1 %v5264_v24  ;;  %v2599_v24 = vld [vmem:[#allocation9 + $0x2f0] sm:$0xff] }
 0x30a   : > { %5269 = vmatprep.subr.bf16.mxu1 %v5268_v31  ;;  %v5300_v43 = vpack.c.bf16 %v2600_v25, %v2599_v24  ;;  %v2868_v25 = vld [vmem:[#allocation9 + $0x3b0] sm:$0xff] }
 0x30d   : > { %5271 = vmatpush3.bf16.msra.mxu1 %v5268_v31  ;;  %v5304_v31 = vpack.c.bf16 %v2725_v29, %v2724_v26  ;;  %v2870_v29 = vld [vmem:[#allocation9 + $0x3c0] sm:$0xff] }
 0x30e   : > { %5273 = vmatprep.subr.bf16.mxu1 %v5272_v39 }
 0x310   : > { %4593 = vmatmul.mubr.f32.vlgmr.msra.gmra.mrb[0].mxu1 %v6247_v40 }
 0x311   : > { %4595 = vmatprep.mubr.f32.mxu1 %v6257_v54  ;;  %5275 = vmatpush3.bf16.msra.mxu1 %v5272_v39  ;;  %v5312_v39 = vpack.c.bf16 %v2729_v27, %v2728_v36  ;;  %v2877_v36 = vld [vmem:[#allocation9 + $0x3f8] sm:$0xff]  ;;  %v3000_v27 = vld [vmem:[#allocation9 + $0x400] sm:$0xff] }
 0x312   : > { %5277 = vmatprep.subr.bf16.mxu1 %v5276_v50 }
 0x314   : > { %4596 = vmatmul.mubr.f32.gmra.mrb[2].mxu1 %v6254_v51 }
 0x315   : > { %4598 = vmatprep.mubr.f32.mxu1 %v6265_v1  ;;  %5279 = vmatpush3.bf16.msra.mxu1 %v5276_v50  ;;  %v2733_v50 = vld [vmem:[#allocation9 + $0x348] sm:$0xff] }
 0x316   : > { %5281 = vmatprep.subr.bf16.mxu1 %v5280_v58  ;;  %v5320_v52 = vpack.c.bf16 %v2733_v50, %v2732_v49  ;;  %v3005_v49 = vld [vmem:[#allocation9 + $0x428] sm:$0xff] }
 0x318   : > { %4599 = vmatmul.mubr.f32.gmra.mrb[4].mxu1 %v6262_v62 }
 0x319   : > { %4601 = vmatprep.mubr.f32.mxu1 %v6273_v9  ;;  %5283 = vmatpush3.bf16.msra.mxu1 %v5280_v58  ;;  %v5324_v58 = vpack.c.bf16 %v2735_v57, %v2734_v56  ;;  %v3007_v56 = vld [vmem:[#allocation9 + $0x438] sm:$0xff] }
 0x31a   : > { %5285 = vmatprep.subr.bf16.mxu1 %v5284_v2 }
 0x31c   : > { %4602 = vmatmul.mubr.f32.gmra.mrb[6].mxu1 %v6270_v8 }
 0x31d   : > { %5287 = vmatpush3.bf16.msra.mxu1 %v5284_v2  ;;  %4636 = vmatprep.mubr.f32.mxu1 %v6302_v0  ;;  %v5308_v0 = vpack.c.bf16 %v2727_v34, %v2726_v33  ;;  %v2738_v2 = vld [vmem:[#allocation9 + $0x370] sm:$0xff]  ;;  %v2873_v33 = vld [vmem:[#allocation9 + $0x3d8] sm:$0xff]  ;;  %v2875_v34 = vld [vmem:[#allocation9 + $0x3e8] sm:$0xff] }
 0x31e   : > { %5289 = vmatprep.subr.bf16.mxu1 %v5288_v10  ;;  %v5332_v7 = vpack.c.bf16 %v2739_v3, %v2738_v2  ;;  %v3013_v2 = vld [vmem:[#allocation9 + $0x468] sm:$0xff] }
 0x321   : > { %5291 = vmatpush3.bf16.msra.mxu1 %v5288_v10  ;;  %v2862_v10 = vld [vmem:[#allocation9 + $0x380] sm:$0xff] }
 0x322   : > { %5293 = vmatprep.subr.bf16.mxu1 %v5292_v18  ;;  %v5336_v16 = vpack.c.bf16 %v2863_v15, %v2862_v10  ;;  %v3522_v10 = vld [vmem:[%s6530_s23] ss:$0 sm:$0xff] }
 0x325   : > { %5295 = vmatpush3.bf16.msra.mxu1 %v5292_v18  ;;  %v2864_v18 = vld [vmem:[#allocation9 + $0x390] sm:$0xff] }
 0x326   : > { %5297 = vmatprep.subr.bf16.mxu1 %v5296_v23 }
 0x329   : > { %5299 = vmatpush3.bf16.msra.mxu1 %v5296_v23  ;;  %v2867_v23 = vld [vmem:[#allocation9 + $0x3a8] sm:$0xff] }
 0x32a   : > { %5301 = vmatprep.subr.bf16.mxu1 %v5300_v43  ;;  %v5344_v24 = vpack.c.bf16 %v2867_v23, %v2866_v21 }
 0x32d   : > { %5303 = vmatpush3.bf16.msra.mxu1 %v5300_v43  ;;  %v2869_v43 = vld [vmem:[#allocation9 + $0x3b8] sm:$0xff] }
 0x32e   : > { %5305 = vmatprep.subr.bf16.mxu1 %v5304_v31  ;;  %v5348_v26 = vpack.c.bf16 %v2869_v43, %v2868_v25 }
 0x330   : > { %4637 = vmatmul.mubr.f32.vlgmr.msra.gmra.mrb[0].mxu1 %v6305_v4 }
 0x331   : > { %4639 = vmatprep.mubr.f32.mxu1 %v6308_v6  ;;  %5307 = vmatpush3.bf16.msra.mxu1 %v5304_v31  ;;  %v2871_v31 = vld [vmem:[#allocation9 + $0x3c8] sm:$0xff] }
 0x332   : > { %5309 = vmatprep.subr.bf16.mxu1 %v5308_v0 }
 0x334   : > { %4640 = vmatmul.mubr.f32.gmra.mrb[2].mxu1 %v6311_v11 }
 0x335   : > { %4642 = vmatprep.mubr.f32.mxu1 %v6314_v14  ;;  %5311 = vmatpush3.bf16.msra.mxu1 %v5308_v0 }
 0x336   : > { %5313 = vmatprep.subr.bf16.mxu1 %v5312_v39 }
 0x338   : > { %4643 = vmatmul.mubr.f32.gmra.mrb[4].mxu1 %v6317_v17 }
 0x339   : > { %4645 = vmatprep.mubr.f32.mxu1 %v6320_v19  ;;  %5315 = vmatpush3.bf16.msra.mxu1 %v5312_v39  ;;  %v3001_v39 = vld [vmem:[#allocation9 + $0x408] sm:$0xff] }
 0x33a   : > { %5317 = vmatprep.subr.bf16.mxu1 %v5316_v46 }
 0x33c   : > { %4646 = vmatmul.mubr.f32.gmra.mrb[6].mxu1 %v6380_v53 }
 0x33d   : > { %5319 = vmatpush3.bf16.msra.mxu1 %v5316_v46  ;;  %4680 = vmatprep.mubr.f32.mxu1 %v6284_v30  ;;  %v5340_v30 = vpack.c.bf16 %v2865_v20, %v2864_v18  ;;  %v3004_v46 = vld [vmem:[#allocation9 + $0x420] sm:$0xff] }
 0x33e   : > { %5321 = vmatprep.subr.bf16.mxu1 %v5320_v52  ;;  %v5376_v50 = vpack.c.bf16 %v3005_v49, %v3004_v46 }
 0x341   : > { %5323 = vmatpush3.bf16.msra.mxu1 %v5320_v52  ;;  %v3006_v52 = vld [vmem:[#allocation9 + $0x430] sm:$0xff] }
 0x342   : > { %5325 = vmatprep.subr.bf16.mxu1 %v5324_v58  ;;  %v5380_v57 = vpack.c.bf16 %v3007_v56, %v3006_v52 }
 0x345   : > { %5327 = vmatpush3.bf16.msra.mxu1 %v5324_v58  ;;  %v3008_v58 = vld [vmem:[#allocation9 + $0x440] sm:$0xff] }
 0x346   : > { %5329 = vmatprep.subr.bf16.mxu1 %v5328_v63 }
 0x349   : > { %5331 = vmatpush3.bf16.msra.mxu1 %v5328_v63  ;;  %v3011_v63 = vld [vmem:[#allocation9 + $0x458] sm:$0xff] }
 0x34a   : > { %5333 = vmatprep.subr.bf16.mxu1 %v5332_v7 }
 0x34d   : > { %5335 = vmatpush3.bf16.msra.mxu1 %v5332_v7  ;;  %v3015_v7 = vld [vmem:[#allocation9 + $0x478] sm:$0xff] }
 0x34e   : > { %5337 = vmatprep.subr.bf16.mxu1 %v5336_v16 }
 0x350   : > { %4681 = vmatmul.mubr.f32.vlgmr.msra.gmra.mrb[0].mxu1 %v6287_v32  ;;  %v5352_v32 = vpack.c.bf16 %v2871_v31, %v2870_v29 }
 0x351   : > { %4683 = vmatprep.mubr.f32.mxu1 %v6290_v35  ;;  %5339 = vmatpush3.bf16.msra.mxu1 %v5336_v16  ;;  %v2872_v35 = vld [vmem:[#allocation9 + $0x3d0] sm:$0xff] }
 0x352   : > { %5341 = vmatprep.subr.bf16.mxu1 %v5340_v30 }
 0x354   : > { %4684 = vmatmul.mubr.f32.gmra.mrb[2].mxu1 %v6293_v37  ;;  %v5356_v37 = vpack.c.bf16 %v2873_v33, %v2872_v35 }
 0x355   : > { %4686 = vmatprep.mubr.f32.mxu1 %v6296_v41  ;;  %5343 = vmatpush3.bf16.msra.mxu1 %v5340_v30  ;;  %v2874_v41 = vld [vmem:[#allocation9 + $0x3e0] sm:$0xff] }
 0x356   : > { %5345 = vmatprep.subr.bf16.mxu1 %v5344_v24  ;;  %v5360_v0 = vpack.c.bf16 %v2875_v34, %v2874_v41 }
 0x358   : > { %4687 = vmatmul.mubr.f32.gmra.mrb[4].mxu1 %v6299_v45  ;;  %v2876_v45 = vld [vmem:[#allocation9 + $0x3f0] sm:$0xff] }
 0x359   : > { %4689 = vmatprep.mubr.f32.mxu1 %v6341_v5  ;;  %5347 = vmatpush3.bf16.msra.mxu1 %v5344_v24  ;;  %v5364_v5 = vpack.c.bf16 %v2877_v36, %v2876_v45 }
 0x35a   : > { %5349 = vmatprep.subr.bf16.mxu1 %v5348_v26 }
 0x35c   : > { %4690 = vmatmul.mubr.f32.gmra.mrb[6].mxu1 %v6278_v13  ;;  %v5368_v13 = vpack.c.bf16 %v3001_v39, %v3000_v27 }
 0x35d   : > { %5351 = vmatpush3.bf16.msra.mxu1 %v5348_v26  ;;  %4724 = vmatprep.mubr.f32.mxu1 %v6247_v40  ;;  %v5372_v40 = vpack.c.bf16 %v3003_v44, %v3002_v42 }
 0x35e   : > { %5353 = vmatprep.subr.bf16.mxu1 %v5352_v32 }
 0x361   : > { %5355 = vmatpush3.bf16.msra.mxu1 %v5352_v32 }
 0x362   : > { %5357 = vmatprep.subr.bf16.mxu1 %v5356_v37 }
 0x365   : > { %5359 = vmatpush3.bf16.msra.mxu1 %v5356_v37 }
 0x366   : > { %5361 = vmatprep.subr.bf16.mxu1 %v5360_v0 }
 0x369   : > { %5363 = vmatpush3.bf16.msra.mxu1 %v5360_v0 }
 0x36a   : > { %5365 = vmatprep.subr.bf16.mxu1 %v5364_v5 }
 0x36d   : > { %5367 = vmatpush3.bf16.msra.mxu1 %v5364_v5 }
 0x36e   : > { %5369 = vmatprep.subr.bf16.mxu1 %v5368_v13 }
 0x370   : > { %4725 = vmatmul.mubr.f32.vlgmr.msra.gmra.mrb[0].mxu1 %v6257_v54  ;;  %v5384_v54 = vpack.c.bf16 %v3009_v59, %v3008_v58 }
 0x371   : > { %4727 = vmatprep.mubr.f32.mxu1 %v6254_v51  ;;  %5371 = vmatpush3.bf16.msra.mxu1 %v5368_v13  ;;  %v2860_v51 = vld [vmem:[#allocation3 + $0x91] sm:$0xff] }
 0x372   : > { %5373 = vmatprep.subr.bf16.mxu1 %v5372_v40 }
 0x374   : > { %4728 = vmatmul.mubr.f32.gmra.mrb[2].mxu1 %v6265_v1  ;;  %v3012_v1 = vld [vmem:[#allocation9 + $0x460] sm:$0xff] }
 0x375   : > { %4730 = vmatprep.mubr.f32.mxu1 %v6262_v62  ;;  %5375 = vmatpush3.bf16.msra.mxu1 %v5372_v40  ;;  %v5388_v62 = vpack.c.bf16 %v3011_v63, %v3010_v60  ;;  %v5392_v3 = vpack.c.bf16 %v3013_v2, %v3012_v1 }
 0x376   : > { %5377 = vmatprep.subr.bf16.mxu1 %v5376_v50 }
 0x378   : > { %4731 = vmatmul.mubr.f32.gmra.mrb[4].mxu1 %v6273_v9  ;;  %v3014_v9 = vld [vmem:[#allocation9 + $0x470] sm:$0xff] }
 0x379   : > { %4733 = vmatprep.mubr.f32.mxu1 %v6270_v8  ;;  %5379 = vmatpush3.bf16.msra.mxu1 %v5376_v50  ;;  %v5396_v8 = vpack.c.bf16 %v3015_v7, %v3014_v9 }
 0x37a   : > { %5381 = vmatprep.subr.bf16.mxu1 %v5380_v57 }
 0x37c   : > { %4734 = vmatmul.mubr.f32.gmra.mrb[6].mxu1 %v2860_v51 }
 0x37d   : > { %5383 = vmatpush3.bf16.msra.mxu1 %v5380_v57  ;;  %4768 = vmatprep.mubr.f32.mxu1 %v6305_v4  ;;  %v2998_v4 = vld [vmem:[#allocation3 + $0x92] sm:$0xff] }
 0x37e   : > { %5385 = vmatprep.subr.bf16.mxu1 %v5384_v54 }
 0x381   : > { %5387 = vmatpush3.bf16.msra.mxu1 %v5384_v54 }
 0x382   : > { %5389 = vmatprep.subr.bf16.mxu1 %v5388_v62 }
 0x385   : > { %5391 = vmatpush3.bf16.msra.mxu1 %v5388_v62 }
 0x386   : > { %5393 = vmatprep.subr.bf16.mxu1 %v5392_v3 }
 0x389   : > { %5395 = vmatpush3.bf16.msra.mxu1 %v5392_v3 }
 0x38a   : > { %5397 = vmatprep.subr.bf16.mxu1 %v5396_v8 }
 0x38d   : > { %5399 = vmatpush3.bf16.msra.mxu1 %v5396_v8 }
 0x38e   : > { %5432 = vmatprep.subr.bf16.mxu1 %v6324_v47 }
 0x390   : > { %4769 = vmatmul.mubr.f32.vlgmr.msra.gmra.mrb[0].mxu1 %v6308_v6  ;;  %v3163_v6 = vld [vmem:[#allocation2 + $0xd9] ss:$2 sm:$0xff] }
 0x391   : > { %4771 = vmatprep.mubr.f32.mxu1 %v6311_v11  ;;  %5440 = vmatpush3.bf16.msra.mxu1 %v6324_v47  ;;  %v3164_v11 = vld [vmem:[#allocation2 + $0x109] ss:$2 sm:$0xff] }
 0x392   : > { %5433 = vmatprep.subr.bf16.mxu1 %v6330_v55 }
 0x394   : > { %4772 = vmatmul.mubr.f32.gmra.mrb[2].mxu1 %v6314_v14  ;;  %v3165_v14 = vld [vmem:[#allocation2 + $0x139] ss:$2 sm:$0xff] }
 0x395   : > { %4774 = vmatprep.mubr.f32.mxu1 %v6317_v17  ;;  %5441 = vmatpush3.bf16.msra.mxu1 %v6330_v55  ;;  %v3166_v17 = vld [vmem:[#allocation2 + $0x169] ss:$2 sm:$0xff] }
 0x396   : > { %5434 = vmatprep.subr.bf16.mxu1 %v6336_v61 }
 0x398   : > { %4775 = vmatmul.mubr.f32.gmra.mrb[4].mxu1 %v6320_v19 }
 0x399   : > { %4777 = vmatprep.mubr.f32.mxu1 %v6380_v53  ;;  %5442 = vmatpush3.bf16.msra.mxu1 %v6336_v61 }
 0x39a   : > { %5435 = vmatprep.subr.bf16.mxu1 %v6344_v12 }
 0x39c   : > { %4778 = vmatmul.mubr.f32.gmra.mrb[6].mxu1 %v2998_v4 }
 0x39d   : > { %5443 = vmatpush3.bf16.msra.mxu1 %v6344_v12  ;;  %4818 = vmatprep.mubr.f32.mxu1 %v3163_v6  ;;  %v3523_v12 = vld [vmem:[%s6503_s8] ss:$0 sm:$0xff] }
 0x39e   : > { %5436 = vmatprep.subr.bf16.mxu1 %v6350_v22 }
 0x3a1   : > { %5444 = vmatpush3.bf16.msra.mxu1 %v6350_v22 }
 0x3a2   : > { %5437 = vmatprep.subr.bf16.mxu1 %v6354_v28 }
 0x3a5   : > { %5445 = vmatpush3.bf16.msra.mxu1 %v6354_v28  ;;  %v3521_v28 = vld [vmem:[%s6500_s5] ss:$0 sm:$0xff] }
 0x3a6   : > { %5438 = vmatprep.subr.bf16.mxu1 %v6358_v38 }
 0x3a9   : > { %5446 = vmatpush3.bf16.msra.mxu1 %v6358_v38  ;;  %v3524_v38 = vld [vmem:[%s6504_s9] ss:$0 sm:$0xff] }
 0x3aa   : > { %5439 = vmatprep.subr.bf16.mxu1 %v6362_v48 }
 0x3ad   : > { %5447 = vmatpush3.bf16.msra.mxu1 %v6362_v48 }
 0x3b0   : > { %4819 = vmatmul.mubr.f32.vlgmr.msra.gmra.mrb[8].mxu1 %v3164_v11 }
 0x3b1   : > { %4821 = vmatprep.mubr.f32.mxu1 %v3165_v14 }
 0x3b4   : > { %4822 = vmatmul.mubr.f32.gmra.mrb[10].mxu1 %v3166_v17 }
 0x3d4   : > { %v4814_v19 = vpop.f32.mrb[8].mxu0 }
 0x3d5   : > { %v3249_v47 = vpop.f32.mrb[9].mxu0  ;;  %v3296_v22 = vmul.f32 %v4814_v19, %v3523_v12 }
 0x3d6   : > { %v3295_v48 = vmul.f32 %v3523_v12, %v3249_v47 }
 0x3d7   : > { %v3311_v16 = vadd.f32 %v3524_v38, %v3296_v22 }
 0x3d8   : > { %v4817_v55 = vpop.f32.mrb[10].mxu0  ;;  %v3310_v21 = vadd.f32 %v3524_v38, %v3295_v48 }
 0x3d9   : > { %v3259_v61 = vpop.f32.mrb[11].mxu0  ;;  %v3298_v20 = vmul.f32 %v4817_v55, %v3523_v12 }
 0x3da   : > { %v3297_v23 = vmul.f32 %v3523_v12, %v3259_v61 }
 0x3db   : > { %v3313_v31 = vadd.f32 %v3524_v38, %v3298_v20 }
 0x3dc   : > { %v3312_v37 = vadd.f32 %v3524_v38, %v3297_v23 }
 0x463   : > { %v4770_v53 = vpop.f32.mrb[0].mxu1 }
 0x464   : > { %v3137_v15 = vmul.f32 %v4770_v53, %v3521_v28  ;;  %v3082_v18 = vpop.f32.mrb[1].mxu1 }
 0x465   : > { %v3136_v30 = vmul.f32 %v3521_v28, %v3082_v18 }
 0x466   : > { %v3152_v24 = vadd.f32 %v3522_v10, %v3137_v15 }
 0x467   : > { %v3151_v25 = vadd.f32 %v3522_v10, %v3136_v30  ;;  %v4773_v43 = vpop.f32.mrb[2].mxu1 }
 0x468   : > { %v3319_v26 = vadd.f32 %v3311_v16, %v3152_v24  ;;  %v3139_v29 = vmul.f32 %v4773_v43, %v3521_v28  ;;  %v3092_v32 = vpop.f32.mrb[3].mxu1 }
 0x469   : > { %v3318_v35 = vadd.f32 %v3310_v21, %v3151_v25  ;;  %v3138_v33 = vmul.f32 %v3521_v28, %v3092_v32 }
 0x46a   : > { %v3327_v41 = vmax.f32 %v3319_v26, 0.0  ;;  %v3154_v34 = vadd.f32 %v3522_v10, %v3139_v29 }
 0x46b   : > { %v3326_v0 = vmax.f32 %v3318_v35, 0.0  ;;  %v3153_v45 = vadd.f32 %v3522_v10, %v3138_v33  ;;  %v4776_v36 = vpop.f32.mrb[4].mxu1 }
 0x46c   : > { %3335 = vst [vmem:[%s6434_s19 + $0x8] sm:$0xff] %v3327_v41  ;;  %v3321_v5 = vadd.f32 %v3313_v31, %v3154_v34  ;;  %v3102_v27 = vpop.f32.mrb[5].mxu1  ;;  %v3141_v46 = vmul.f32 %v4776_v36, %v3521_v28 }
 0x46d   : > { %3334 = vst [vmem:[%s6434_s19] sm:$0xff] %v3326_v0  ;;  %v3320_v39 = vadd.f32 %v3312_v37, %v3153_v45  ;;  %v3140_v49 = vmul.f32 %v3521_v28, %v3102_v27 }
 0x46e   : > { %v3329_v13 = vmax.f32 %v3321_v5, 0.0  ;;  %v3156_v58 = vadd.f32 %v3522_v10, %v3141_v46 }
 0x46f   : > { %v3328_v42 = vmax.f32 %v3320_v39, 0.0  ;;  %v4779_v44 = vpop.f32.mrb[6].mxu1  ;;  %v3155_v54 = vadd.f32 %v3522_v10, %v3140_v49 }
 0x470   : > { %3337 = vst [vmem:[%s6434_s19 + $0x18] sm:$0xff] %v3329_v13  ;;  %v3112_v40 = vpop.f32.mrb[7].mxu1  ;;  %v3143_v59 = vmul.f32 %v4779_v44, %v3521_v28 }
 0x471   : > { %3336 = vst [vmem:[%s6434_s19 + $0x10] sm:$0xff] %v3328_v42  ;;  %v3142_v60 = vmul.f32 %v3521_v28, %v3112_v40 }
 0x472   : > { %v3158_v8 = vadd.f32 %v3522_v10, %v3143_v59 }
 0x473   : > { %v3157_v11 = vadd.f32 %v3522_v10, %v3142_v60 }
 0x483   : > { %v4820_v50 = vpop.f32.mrb[8].mxu1 }
 0x484   : > { %v3300_v52 = vmul.f32 %v4820_v50, %v3523_v12  ;;  %v3269_v56 = vpop.f32.mrb[9].mxu1 }
 0x485   : > { %v3299_v57 = vmul.f32 %v3523_v12, %v3269_v56 }
 0x486   : > { %v3315_v51 = vadd.f32 %v3524_v38, %v3300_v52 }
 0x487   : > { %v3314_v63 = vadd.f32 %v3524_v38, %v3299_v57  ;;  %v4823_v62 = vpop.f32.mrb[10].mxu1 }
 0x488   : > { %v3323_v1 = vadd.f32 %v3315_v51, %v3156_v58  ;;  %v3302_v2 = vmul.f32 %v4823_v62, %v3523_v12  ;;  %v3279_v3 = vpop.f32.mrb[11].mxu1 }
 0x489   : > { %v3322_v9 = vadd.f32 %v3314_v63, %v3155_v54  ;;  %v3301_v7 = vmul.f32 %v3523_v12, %v3279_v3 }
 0x48a   : > { %v3331_v4 = vmax.f32 %v3323_v1, 0.0  ;;  %v3317_v6 = vadd.f32 %v3524_v38, %v3302_v2 }
 0x48b   : > { %v3330_v14 = vmax.f32 %v3322_v9, 0.0  ;;  %v3316_v17 = vadd.f32 %v3524_v38, %v3301_v7 }
 0x48c   : > { %3339 = vst [vmem:[%s6434_s19 + $0x28] sm:$0xff] %v3331_v4  ;;  %v3325_v19 = vadd.f32 %v3317_v6, %v3158_v8 }
 0x48d   : > { %3338 = vst [vmem:[%s6434_s19 + $0x20] sm:$0xff] %v3330_v14  ;;  %v3324_v47 = vadd.f32 %v3316_v17, %v3157_v11 }
 0x48e   : > { %v3333_v55 = vmax.f32 %v3325_v19, 0.0 }
 0x48f   : > { %v3332_v61 = vmax.f32 %v3324_v47, 0.0 }
 0x490   : > { %3341 = vst [vmem:[%s6434_s19 + $0x38] sm:$0xff] %v3333_v55 }
 0x491   : > { %3340 = vst [vmem:[%s6434_s19 + $0x30] sm:$0xff] %v3332_v61 }
 0x492   : > { %5786 = shalt.err (!%p5783_p4)
}
 0x493   : > { %s5787_s25 = scalar_lea.hbm %s6447_s6, 1024  ;;  %s5791_s19 = scalar_lea.hbm %s6531_s26, 2048 }
 0x494   : > { %p5788_p9 = scmp.ne.s32.totalorder %s6447_s6, %s5787_s25  ;;  %p5792_p8 = scmp.lt.u32.totalorder %s6447_s6, %s6531_s26 }
 0x495   : > { %p5793_p13 = scmp.lt.u32.totalorder %s5791_s19, %s5787_s25  ;;  %p5795_p10 = scmp.lt.u32.totalorder %s5787_s25, %s6447_s6 }
 0x496   : > { %p5789_p0 = pnand %p5788_p9, %p6068_p5 }
 0x497   : > { %p5794_p6 = por %p5793_p13, %p5792_p8 }
 0x498   : > { %p5790_p11 = pneg %p5789_p0 }
 0x499   : > { %p5796_p3 = por %p5795_p10, %p5794_p6 }
 0x49b   : > { %p5797_p7 = pnand %p5796_p3, %p5790_p11 }
 0x49d   : > { %5800 = shalt.err (!%p5797_p7)
}
 0x49e   : > { %s5857_s29 = smov 128   ;;  %s5858_s24 = smov 8  }
 0x49f   : > { %5590 = dma.vmem_to_hbm [thread:$0]  (%p6068_p5), %s6449_s30, 1024, %s6447_s6, %s3343_s17, %s5857_s29, %s5857_s29, %s5858_s24  }
 0x4a0 PF: > { %s6532_s18 = sld [smem:[#allocation17_spill]]  ;;  %s6533_s28 = sld [smem:[#allocation18_spill]] }
 0x4a1   : > { %p6535_p1 = scmp.ge.s32.totalorder %s5847_s16, 2 }
 0x4a6   : > { %s3371_s27 = sand.u32 1, %s6532_s18   ;;  %p6534_p12 = scmp.ne.s32.totalorder %s6533_s28, 0 }
 0x4a7   : > { %s3372_s25 = scalar_lea.sflag [#allocation6], %s3371_s27 }
 0x4a8   : > { %p5607_p2 = pnand %p6535_p1, %p6534_p12 }
 0x4aa   : > { %5830 = dma.done.wait (!%p5607_p2), %s3372_s25, 1024  }
 0x4ab   : > { %5832 = vsyncadd (!%p5607_p2), %s3372_s25, 4294966272  ;;  %s6536_s23 = smov %s6064_s13  ;;  %p25_p4 = scmp.ge.s32.totalorder %s6054_s22, 4  }
 0x4ac   : > { %s6537_s13 = smov %s5839_s14  ;;  %s6538_s14 = smov %s5843_s15 }
 0x4ad   : > { %s6539_s15 = smov %s6536_s23  ;;  %s6540_s16 = smov %s6054_s22 }
 0x4ae   :  { %27 = sbr.rel (!%p25_p4) target bundleno = 10 (0xa), region = 206 }
 0x4b5   :  { %3377 = vsyncpa [#allocation5], 1 }
 0x4b6   :  { %3379 = vsyncpa [#allocation5 + $0x1], 1 }
 0x4b7   :  { %3380 = vsyncpa [#allocation8], 1 }
 0x4b8   :  { %3381 = vsyncpa [#allocation11], 1 }
 0x4b9   :  { %3382 = vsyncpa [#allocation6], 1 }
 0x4ba   :  { %3384 = vsyncpa [#allocation6 + $0x1], 1 }

</bundles_post_ra>
